<compile_context>
chip_gen: v7x
topology: tpu7x:2x2x1
jax: 0.10.0
libtpu: 0.0.40
codegen_flags: <defaults>
</compile_context>

<pallas_src>
import functools

import jax
import jax.numpy as jnp
from jax import lax
from jax.experimental import pallas as pl
from jax.experimental.pallas import tpu as pltpu


# ---------------------------------------------------------------------------
# Small helpers
# ---------------------------------------------------------------------------

def _erf_f32(x):
  # Abramowitz & Stegun 7.1.26 approximation (|err| < 1.5e-7, ~f32 exact).
  a1, a2, a3, a4, a5 = 0.254829592, -0.284496736, 1.421413741, -1.453152027, 1.061405429
  p = 0.3275911
  ax = jnp.abs(x)
  t = 1.0 / (1.0 + p * ax)
  y = 1.0 - ((((a5 * t + a4) * t + a3) * t + a2) * t + a1) * t * jnp.exp(-ax * ax)
  return jnp.where(x >= 0.0, y, -y)


def _gelu_exact(x):
  # Matches PyTorch nn.GELU() (erf-based) semantics up to ~1.5e-7.
  return 0.5 * x * (1.0 + _erf_f32(x * 0.7071067811865476))


@functools.lru_cache(maxsize=None)
def _vmem_capacity_bytes():
  try:
    cap = getattr(pltpu.get_tpu_info(), "vmem_capacity_bytes", None)
    if cap:
      return int(cap)
  except Exception:
    pass
  return 128 * 1024 * 1024


@functools.lru_cache(maxsize=None)
def _vmem_limit_bytes():
  cap = _vmem_capacity_bytes()
  return int(min(cap * 3 // 4, 96 * 1024 * 1024))


def _cparams(dims):
  return pltpu.CompilerParams(dimension_semantics=dims,
                              vmem_limit_bytes=_vmem_limit_bytes())


def _row_tiling(n, target):
  """Return (tile, padded_n): tile divides padded_n, tile <= max(target, n)."""
  if n <= target:
    pn = -(-n // 8) * 8
    return pn, pn
  for t in range(target, 7, -1):
    if n % t == 0 and t % 8 == 0:
      return t, n
  pn = -(-n // target) * target            # pad instead of one huge block
  return target, pn


def _seq_tile(s, target):
  if s <= target:
    return s
  for t in range(target, 7, -1):
    if s % t == 0 and t % 8 == 0:
      return t
  return s  # TODO(synk): no aligned divisor — full-sequence fallback.


def _chunk_tile(m, target):
  """Largest tile <= target dividing m, preferring multiples of 128."""
  if m <= target:
    return m
  for t in range(target, 127, -1):
    if m % t == 0 and t % 128 == 0:
      return t
  for t in range(target, 7, -1):
    if m % t == 0 and t % 8 == 0:
      return t
  return m


def _cin_tile(c, target=256):
  """Cin chunk for the qkv-weight K-tiling (lane-aligned or a single chunk)."""
  if c <= target or c % 128 != 0:
    return c
  for t in range(target, 127, -128):
    if c % t == 0:
      return t
  return c


# ---------------------------------------------------------------------------
# Kernels
# ---------------------------------------------------------------------------

def _ln_qkv_kernel(x_ref, g_ref, b_ref, wq_ref, wk_ref, wv_ref,
                   bq_ref, bk_ref, bv_ref, q_ref, k_ref, v_ref,
                   xn_sc, qa_sc, ka_sc, va_sc, *, eps, tkc, single_chunk):
  """Fused LayerNorm1 + qkv projection; grid axis 1 reduces over Cin chunks."""
  j = pl.program_id(1)

  @pl.when(j == 0)
  def _():
    x = x_ref[...].astype(jnp.float32)
    mean = jnp.mean(x, axis=-1, keepdims=True)
    var = jnp.mean(jnp.square(x - mean), axis=-1, keepdims=True)
    xn = (x - mean) * lax.rsqrt(var + eps)
    xn = xn * g_ref[...].astype(jnp.float32) + b_ref[...].astype(jnp.float32)
    xn_sc[...] = xn.astype(xn_sc.dtype)
    qa_sc[...] = jnp.zeros_like(qa_sc)
    ka_sc[...] = jnp.zeros_like(ka_sc)
    va_sc[...] = jnp.zeros_like(va_sc)

  if single_chunk:
    xk = xn_sc[...]
  else:
    off = pl.multiple_of(j * tkc, tkc)
    xk = xn_sc[:, pl.ds(off, tkc)]

  qa_sc[...] += jnp.dot(xk, wq_ref[...], preferred_element_type=jnp.float32)
  ka_sc[...] += jnp.dot(xk, wk_ref[...], preferred_element_type=jnp.float32)
  va_sc[...] += jnp.dot(xk, wv_ref[...], preferred_element_type=jnp.float32)

  @pl.when(j == pl.num_programs(1) - 1)
  def _():
    q_ref[...] = (qa_sc[...] + bq_ref[...].astype(jnp.float32)).astype(q_ref.dtype)
    k_ref[...] = (ka_sc[...] + bk_ref[...].astype(jnp.float32)).astype(k_ref.dtype)
    v_ref[...] = (va_sc[...] + bv_ref[...].astype(jnp.float32)).astype(v_ref.dtype)


def _attention_kernel(q_ref, k_ref, v_ref, o_ref, m_sc, l_sc, acc_sc, *,
                      num_heads, head_dim):
  """All-heads flash attention on one (window, q-tile); reduces over KV chunks.

  The attention scale is already folded into the q projection. Heads are unrolled
  statically (small num_heads); all heads are batched into one grid step.
  """
  ki = pl.program_id(2)

  @pl.when(ki == 0)
  def _():
    m_sc[...] = jnp.full(m_sc.shape, -jnp.inf, jnp.float32)
    l_sc[...] = jnp.zeros(l_sc.shape, jnp.float32)
    acc_sc[...] = jnp.zeros(acc_sc.shape, jnp.float32)

  q = q_ref[0]   # (tq, C)
  k = k_ref[0]   # (tk, C)
  v = v_ref[0]   # (tk, C)

  for h in range(num_heads):
    lo = h * head_dim
    qh = q[:, lo:lo + head_dim]
    kh = k[:, lo:lo + head_dim]
    vh = v[:, lo:lo + head_dim]

    s = lax.dot_general(qh, kh, (((1,), (1,)), ((), ())),
                        preferred_element_type=jnp.float32)          # (tq, tk)

    m_prev = m_sc[h]
    m_new = jnp.maximum(m_prev, jnp.max(s, axis=-1, keepdims=True))
    alpha = jnp.exp(m_prev - m_new)
    p = jnp.exp(s - m_new)
    l_sc[h] = alpha * l_sc[h] + jnp.sum(p, axis=-1, keepdims=True)
    acc_sc[h] = alpha * acc_sc[h] + jnp.dot(p.astype(vh.dtype), vh,
                                            preferred_element_type=jnp.float32)
    m_sc[h] = m_new

  @pl.when(ki == pl.num_programs(2) - 1)
  def _():
    outs = [acc_sc[h] * pl.reciprocal(l_sc[h], approx=True)
            for h in range(num_heads)]
    o_ref[0] = jnp.concatenate(outs, axis=-1).astype(o_ref.dtype)    # (tq, C)


def _proj_residual_kernel(x_ref, w_ref, b_ref, r_ref, o_ref):
  """Dense projection + bias + residual add."""
  y = jnp.dot(x_ref[...], w_ref[...], preferred_element_type=jnp.float32)
  o_ref[...] = (y + b_ref[...].astype(jnp.float32)
                + r_ref[...].astype(jnp.float32)).astype(o_ref.dtype)


def _mlp_kernel(x_ref, g_ref, b_ref, w1_ref, b1_ref, w2_ref, b2_ref, o_ref,
                xn_sc, acc_sc, *, eps):
  """Fused LayerNorm2 + fc1 + GELU + fc2 + residual; grid axis 1 reduces mlp_dim chunks."""
  j = pl.program_id(1)

  @pl.when(j == 0)
  def _():
    x = x_ref[...].astype(jnp.float32)
    mean = jnp.mean(x, axis=-1, keepdims=True)
    var = jnp.mean(jnp.square(x - mean), axis=-1, keepdims=True)
    xn = (x - mean) * lax.rsqrt(var + eps)
    xn = xn * g_ref[...].astype(jnp.float32) + b_ref[...].astype(jnp.float32)
    xn_sc[...] = xn.astype(xn_sc.dtype)
    acc_sc[...] = jnp.zeros_like(acc_sc)

  h = jnp.dot(xn_sc[...], w1_ref[...], preferred_element_type=jnp.float32)
  h = _gelu_exact(h + b1_ref[...].astype(jnp.float32))
  acc_sc[...] += jnp.dot(h.astype(w2_ref.dtype), w2_ref[...],
                         preferred_element_type=jnp.float32)

  @pl.when(j == pl.num_programs(1) - 1)
  def _():
    o_ref[...] = (acc_sc[...] + b2_ref[...].astype(jnp.float32)
                  + x_ref[...].astype(jnp.float32)).astype(o_ref.dtype)


# ---------------------------------------------------------------------------
# Wrappers around pallas_call
# ---------------------------------------------------------------------------

def ln_qkv(x, gamma, beta, wq, wk, wv, bq, bk, bv, *, eps=1e-5):
  """Fused LayerNorm + qkv projection; returns q, k, v (N, C) in the weight dtype."""
  N, C = x.shape
  tile_n, Np = _row_tiling(N, 512)
  if Np != N:
    x = jnp.pad(x, ((0, Np - N), (0, 0)))
  tkc = _cin_tile(C)
  nck = C // tkc
  out_dtype = wq.dtype
  kernel = functools.partial(_ln_qkv_kernel, eps=eps, tkc=tkc,
                             single_chunk=(nck == 1))
  q, k, v = pl.pallas_call(
      kernel,
      out_shape=[jax.ShapeDtypeStruct((Np, C), out_dtype) for _ in range(3)],
      grid=(Np // tile_n, nck),
      in_specs=[pl.BlockSpec((tile_n, C), lambda i, j: (i, 0)),
                pl.BlockSpec((1, C), lambda i, j: (0, 0)),
                pl.BlockSpec((1, C), lambda i, j: (0, 0)),
                pl.BlockSpec((tkc, C), lambda i, j: (j, 0)),
                pl.BlockSpec((tkc, C), lambda i, j: (j, 0)),
                pl.BlockSpec((tkc, C), lambda i, j: (j, 0)),
                pl.BlockSpec((1, C), lambda i, j: (0, 0)),
                pl.BlockSpec((1, C), lambda i, j: (0, 0)),
                pl.BlockSpec((1, C), lambda i, j: (0, 0))],
      out_specs=[pl.BlockSpec((tile_n, C), lambda i, j: (i, 0)),
                 pl.BlockSpec((tile_n, C), lambda i, j: (i, 0)),
                 pl.BlockSpec((tile_n, C), lambda i, j: (i, 0))],
      scratch_shapes=[pltpu.VMEM((tile_n, C), out_dtype),
                      pltpu.VMEM((tile_n, C), jnp.float32),
                      pltpu.VMEM((tile_n, C), jnp.float32),
                      pltpu.VMEM((tile_n, C), jnp.float32)],
      compiler_params=_cparams(("parallel", "arbitrary")),
  )(x, gamma.reshape(1, C), beta.reshape(1, C), wq, wk, wv,
    bq.reshape(1, C), bk.reshape(1, C), bv.reshape(1, C))
  if Np != N:
    q, k, v = q[:N], k[:N], v[:N]
  return q, k, v


def attention(q, k, v, *, num_heads):
  """q/k/v: (nB, S, C); scale folded into q. Returns (nB, S, C) head-major output."""
  nB, S, C = q.shape
  hd = C // num_heads
  tq = _seq_tile(S, 512)   # larger q tile: KV re-streamed fewer times
  tk = _seq_tile(S, 256)
  kernel = functools.partial(_attention_kernel, num_heads=num_heads, head_dim=hd)
  return pl.pallas_call(
      kernel,
      out_shape=jax.ShapeDtypeStruct((nB, S, C), q.dtype),
      grid=(nB, S // tq, S // tk),
      in_specs=[pl.BlockSpec((1, tq, C), lambda b, qi, ki: (b, qi, 0)),
                pl.BlockSpec((1, tk, C), lambda b, qi, ki: (b, ki, 0)),
                pl.BlockSpec((1, tk, C), lambda b, qi, ki: (b, ki, 0))],
      out_specs=pl.BlockSpec((1, tq, C), lambda b, qi, ki: (b, qi, 0)),
      scratch_shapes=[pltpu.VMEM((num_heads, tq, 1), jnp.float32),
                      pltpu.VMEM((num_heads, tq, 1), jnp.float32),
                      pltpu.VMEM((num_heads, tq, hd), jnp.float32)],
      compiler_params=_cparams(("parallel", "parallel", "arbitrary")),
  )(q, k, v)


def proj_residual(x, w, b, residual):
  N, Cin = x.shape
  Cout = w.shape[1]
  tile_n, Np = _row_tiling(N, 512)
  if Np != N:
    x = jnp.pad(x, ((0, Np - N), (0, 0)))
    residual = jnp.pad(residual, ((0, Np - N), (0, 0)))
  out = pl.pallas_call(
      _proj_residual_kernel,
      out_shape=jax.ShapeDtypeStruct((Np, Cout), residual.dtype),
      grid=(Np // tile_n,),
      in_specs=[pl.BlockSpec((tile_n, Cin), lambda i: (i, 0)),
                pl.BlockSpec((Cin, Cout), lambda i: (0, 0)),
                pl.BlockSpec((1, Cout), lambda i: (0, 0)),
                pl.BlockSpec((tile_n, Cout), lambda i: (i, 0))],
      out_specs=pl.BlockSpec((tile_n, Cout), lambda i: (i, 0)),
      compiler_params=_cparams(("parallel",)),
  )(x, w, b.reshape(1, Cout), residual)
  return out[:N] if Np != N else out


def mlp_fused(x, gamma, beta, w1, b1, w2, b2, *, eps=1e-5):
  N, C = x.shape
  M = w1.shape[1]
  big_vmem = _vmem_capacity_bytes() >= 96 * 1024 * 1024
  target = 1024 if (big_vmem or jnp.dtype(w1.dtype).itemsize <= 2) else 512
  tile_n, Np = _row_tiling(N, target)
  if Np != N:
    x = jnp.pad(x, ((0, Np - N), (0, 0)))
  tkm = _chunk_tile(M, 512)
  out = pl.pallas_call(
      functools.partial(_mlp_kernel, eps=eps),
      out_shape=jax.ShapeDtypeStruct((Np, C), x.dtype),
      grid=(Np // tile_n, M // tkm),
      in_specs=[pl.BlockSpec((tile_n, C), lambda i, j: (i, 0)),
                pl.BlockSpec((1, C), lambda i, j: (0, 0)),
                pl.BlockSpec((1, C), lambda i, j: (0, 0)),
                pl.BlockSpec((C, tkm), lambda i, j: (0, j)),
                pl.BlockSpec((1, tkm), lambda i, j: (0, j)),
                pl.BlockSpec((tkm, C), lambda i, j: (j, 0)),
                pl.BlockSpec((1, C), lambda i, j: (0, 0))],
      out_specs=pl.BlockSpec((tile_n, C), lambda i, j: (i, 0)),
      scratch_shapes=[pltpu.VMEM((tile_n, C), w1.dtype),
                      pltpu.VMEM((tile_n, C), jnp.float32)],
      compiler_params=_cparams(("parallel", "arbitrary")),
  )(x, gamma.reshape(1, C), beta.reshape(1, C),
    w1, b1.reshape(1, M), w2, b2.reshape(1, C))
  return out[:N] if Np != N else out


# ---------------------------------------------------------------------------
# Window partition glue (pure JAX; matches the PyTorch helpers)
# ---------------------------------------------------------------------------

def _pad_with_fill(x, window_size, fill):
  """Zero-pad to window multiples, then overwrite only the thin pad strips with `fill`."""
  B, H, W, C = x.shape
  pad_h = (window_size - H % window_size) % window_size
  pad_w = (window_size - W % window_size) % window_size
  Hp, Wp = H + pad_h, W + pad_w
  if pad_h or pad_w:
    x = jnp.pad(x, ((0, 0), (0, pad_h), (0, pad_w), (0, 0)))
    if fill is not None:
      fill = fill.astype(x.dtype).reshape(1, 1, 1, C)
      if pad_h:
        strip = jnp.broadcast_to(fill, (B, pad_h, Wp, C))
        x = lax.dynamic_update_slice(x, strip, (0, H, 0, 0))
      if pad_w:
        strip = jnp.broadcast_to(fill, (B, H, pad_w, C))
        x = lax.dynamic_update_slice(x, strip, (0, 0, W, 0))
  return x, (Hp, Wp)


def window_partition_tokens(x, window_size, fill=None):
  """(B,H,W,C) -> (B*nW, ws*ws, C). Pad tokens filled with `fill` (None -> zeros).

  Partitioning happens after the fused norm1+qkv projection, so the k/v pads are filled
  with the k/v biases — the exact values the PyTorch reference produces for zero-padded
  post-norm tokens. Pad tokens still participate in softmax, as in SAM/ViTDet.
  """
  x, (Hp, Wp) = _pad_with_fill(x, window_size, fill)
  B, C = x.shape[0], x.shape[-1]
  x = x.reshape(B, Hp // window_size, window_size, Wp // window_size, window_size, C)
  x = x.transpose(0, 1, 3, 2, 4, 5).reshape(-1, window_size * window_size, C)
  return x, (Hp, Wp)


def window_unpartition(windows, window_size, pad_hw, hw):
  Hp, Wp = pad_hw
  H, W = hw
  B = windows.shape[0] // (Hp * Wp // window_size // window_size)
  x = windows.reshape(B, Hp // window_size, Wp // window_size,
                      window_size, window_size, -1)
  x = x.transpose(0, 1, 3, 2, 4, 5).reshape(B, Hp, Wp, -1)
  if Hp > H or Wp > W:
    x = x[:, :H, :W, :]
  return x


# ---------------------------------------------------------------------------
# Block forward
# ---------------------------------------------------------------------------

def block_forward(params, x, *, num_heads, window_size=0, eps=1e-5,
                  compute_dtype=None):
  """compute_dtype: dtype for matmul operands (weights / attention activations);
  accumulation is always f32 and the residual stream keeps x.dtype."""
  B, H, W, C = x.shape
  hd = C // num_heads
  scale = hd ** -0.5
  N = B * H * W
  shortcut = x.reshape(N, C)
  cdt = compute_dtype if compute_dtype is not None else x.dtype

  # Split qkv weight into per-output C-wide pieces; fold the attention scale into q.
  wq = (params["qkv_w"][:, :C] * scale).astype(cdt)
  wk = params["qkv_w"][:, C:2 * C].astype(cdt)
  wv = params["qkv_w"][:, 2 * C:].astype(cdt)
  bq = (params["qkv_b"][:C] * scale).astype(cdt)
  bk = params["qkv_b"][C:2 * C].astype(cdt)
  bv = params["qkv_b"][2 * C:].astype(cdt)

  # Fused norm1 + qkv projection over real tokens only.
  q, k, v = ln_qkv(shortcut, params["norm1_g"], params["norm1_b"],
                   wq, wk, wv, bq, bk, bv, eps=eps)

  if window_size > 0:
    q_t, pad_hw = window_partition_tokens(q.reshape(B, H, W, C), window_size, fill=None)
    k_t, _ = window_partition_tokens(k.reshape(B, H, W, C), window_size, fill=bk)
    v_t, _ = window_partition_tokens(v.reshape(B, H, W, C), window_size, fill=bv)
  else:
    pad_hw = (H, W)
    q_t = q.reshape(B, H * W, C)
    k_t = k.reshape(B, H * W, C)
    v_t = v.reshape(B, H * W, C)

  # Flash-style multi-head attention; lane-dense (nB, S, C) output, head-major.
  attn = attention(q_t, k_t, v_t, num_heads=num_heads)

  if window_size > 0:
    nB = attn.shape[0]
    attn_img = window_unpartition(attn.reshape(nB, window_size, window_size, C),
                                  window_size, pad_hw, (H, W))
    attn_tok = attn_img.reshape(N, C)
  else:
    attn_tok = attn.reshape(N, C)

  # proj + first residual (runs only on real tokens; pad tokens already dropped).
  x1 = proj_residual(attn_tok, params["proj_w"].astype(cdt), params["proj_b"], shortcut)

  # Fused norm2 + MLP + second residual.
  out = mlp_fused(x1, params["norm2_g"], params["norm2_b"],
                  params["fc1_w"].astype(cdt), params["fc1_b"],
                  params["fc2_w"].astype(cdt), params["fc2_b"], eps=eps)
  return out.reshape(B, H, W, C)


# ---------------------------------------------------------------------------
# Pure-JAX reference (numerical sanity check)
# ---------------------------------------------------------------------------

def _ref_window_partition(x, window_size):
  B, H, W, C = x.shape
  pad_h = (window_size - H % window_size) % window_size
  pad_w = (window_size - W % window_size) % window_size
  if pad_h > 0 or pad_w > 0:
    x = jnp.pad(x, ((0, 0), (0, pad_h), (0, pad_w), (0, 0)))
  Hp, Wp = H + pad_h, W + pad_w
  x = x.reshape(B, Hp // window_size, window_size, Wp // window_size, window_size, C)
  windows = x.transpose(0, 1, 3, 2, 4, 5).reshape(-1, window_size, window_size, C)
  return windows, (Hp, Wp)


def block_reference(params, x, *, num_heads, window_size=0):
  B, H, W, C = x.shape
  hd = C // num_heads
  scale = hd ** -0.5

  def ln(t, g, b, eps=1e-5):
    m = jnp.mean(t, axis=-1, keepdims=True)
    v = jnp.mean((t - m) ** 2, axis=-1, keepdims=True)
    return (t - m) / jnp.sqrt(v + eps) * g + b

  shortcut = x
  h = ln(x, params["norm1_g"], params["norm1_b"])
  if window_size > 0:
    h, pad_hw = _ref_window_partition(h, window_size)
  nB, wh, ww, _ = h.shape
  S = wh * ww
  tokens = h.reshape(nB, S, C)
  qkv = tokens @ params["qkv_w"] + params["qkv_b"]
  qkv = qkv.reshape(nB, S, 3, num_heads, hd).transpose(2, 0, 3, 1, 4)
  qkv = qkv.reshape(3, nB * num_heads, S, hd)
  q, k, v = qkv[0], qkv[1], qkv[2]
  attn = jax.nn.softmax((q * scale) @ jnp.swapaxes(k, -1, -2), axis=-1)
  o = (attn @ v).reshape(nB, num_heads, wh, ww, hd).transpose(0, 2, 3, 1, 4)
  o = o.reshape(nB, S, C) @ params["proj_w"] + params["proj_b"]
  o = o.reshape(nB, wh, ww, C)
  if window_size > 0:
    o = window_unpartition(o, window_size, pad_hw, (H, W))
  x1 = shortcut + o
  h2 = ln(x1, params["norm2_g"], params["norm2_b"])
  m = jax.nn.gelu(h2 @ params["fc1_w"] + params["fc1_b"], approximate=False)
  return x1 + (m @ params["fc2_w"] + params["fc2_b"])


# ---------------------------------------------------------------------------
# Deterministic parameter initialization
# ---------------------------------------------------------------------------

def init_params(key, dim, mlp_dim):
  ks = jax.random.split(key, 12)
  s = 0.02
  f32 = jnp.float32
  return dict(
      norm1_g=1.0 + 0.1 * jax.random.normal(ks[0], (dim,), f32),
      norm1_b=0.1 * jax.random.normal(ks[1], (dim,), f32),
      qkv_w=s * jax.random.normal(ks[2], (dim, 3 * dim), f32),
      qkv_b=s * jax.random.normal(ks[3], (3 * dim,), f32),
      proj_w=s * jax.random.normal(ks[4], (dim, dim), f32),
      proj_b=s * jax.random.normal(ks[5], (dim,), f32),
      norm2_g=1.0 + 0.1 * jax.random.normal(ks[6], (dim,), f32),
      norm2_b=0.1 * jax.random.normal(ks[7], (dim,), f32),
      fc1_w=s * jax.random.normal(ks[8], (dim, mlp_dim), f32),
      fc1_b=s * jax.random.normal(ks[9], (mlp_dim,), f32),
      fc2_w=s * jax.random.normal(ks[10], (mlp_dim, dim), f32),
      fc2_b=s * jax.random.normal(ks[11], (dim,), f32),
  )


if __name__ == "__main__":
  # Highest-precision XLA matmuls so the pure-JAX reference is genuinely f32
  # (default TPU matmul precision is bf16 and would dominate the comparison error).
  jax.config.update("jax_default_matmul_precision", "highest")

  B, H, W, dim, num_heads = 2, 8, 8, 32, 4
  mlp_dim = int(dim * 4.0)

  key = jax.random.PRNGKey(0)
  kx, kp = jax.random.split(key)
  x = jax.random.normal(kx, (B, H, W, dim), jnp.float32)
  params = init_params(kp, dim, mlp_dim)

  # f32 compute path: global attention (window_size=0, the Block default),
  # windowed without padding (ws=4 on 8x8) and with padding (ws=3 -> pads to 9x9).
  out_global = jax.block_until_ready(
      block_forward(params, x, num_heads=num_heads, window_size=0))
  out_win4 = jax.block_until_ready(
      block_forward(params, x, num_heads=num_heads, window_size=4))
  out_win3 = jax.block_until_ready(
      block_forward(params, x, num_heads=num_heads, window_size=3))

  ref_global = block_reference(params, x, num_heads=num_heads, window_size=0)
  ref_win4 = block_reference(params, x, num_heads=num_heads, window_size=4)
  ref_win3 = block_reference(params, x, num_heads=num_heads, window_size=3)

  assert out_global.shape == (B, H, W, dim)
  # Tolerance dominated by the EUP approximate reciprocal in the softmax normalization.
  assert jnp.allclose(out_global, ref_global, atol=1e-3, rtol=1e-3)
  assert jnp.allclose(out_win4, ref_win4, atol=1e-3, rtol=1e-3)
  assert jnp.allclose(out_win3, ref_win3, atol=1e-3, rtol=1e-3)

  # bf16 compute path (weights + attention operands bf16, f32 accumulation).
  out_bf16 = jax.block_until_ready(
      block_forward(params, x, num_heads=num_heads, window_size=4,
                    compute_dtype=jnp.bfloat16))
  assert out_bf16.shape == (B, H, W, dim)
  assert bool(jnp.all(jnp.isfinite(out_bf16)))
  assert jnp.allclose(out_bf16, ref_win4, atol=5e-2, rtol=5e-2)

  print("KERNEL_OK")
</pallas_src>

<mosaic_0001>
module attributes {stable_mosaic.version = 11 : i64} {
  func.func @_ln_qkv_kernel(%arg0: i32, %arg1: i32, %arg2: memref<128x32xf32, #tpu.memory_space<vmem>>, %arg3: memref<1x32xf32, #tpu.memory_space<vmem>>, %arg4: memref<1x32xf32, #tpu.memory_space<vmem>>, %arg5: memref<32x32xf32, #tpu.memory_space<vmem>>, %arg6: memref<32x32xf32, #tpu.memory_space<vmem>>, %arg7: memref<32x32xf32, #tpu.memory_space<vmem>>, %arg8: memref<1x32xf32, #tpu.memory_space<vmem>>, %arg9: memref<1x32xf32, #tpu.memory_space<vmem>>, %arg10: memref<1x32xf32, #tpu.memory_space<vmem>>, %arg11: memref<128x32xf32, #tpu.memory_space<vmem>>, %arg12: memref<128x32xf32, #tpu.memory_space<vmem>>, %arg13: memref<128x32xf32, #tpu.memory_space<vmem>>, %arg14: memref<128x32xf32, #tpu.memory_space<vmem>>, %arg15: memref<128x32xf32, #tpu.memory_space<vmem>>, %arg16: memref<128x32xf32, #tpu.memory_space<vmem>>, %arg17: memref<128x32xf32, #tpu.memory_space<vmem>>) attributes {dimension_semantics = [#tpu.dimension_semantics<parallel>, #tpu.dimension_semantics<arbitrary>], iteration_bounds = array<i64: 1, 1>, scalar_prefetch = 0 : i64, scratch_operands = 4 : i64, tpu.core_type = #tpu.core_type<tc>, window_params = [{transform_indices = @transform_0, window_bounds = array<i64: 128, 32>}, {pipeline_mode = #tpu.pipeline_mode<synchronous>, transform_indices = @transform_1, window_bounds = array<i64: 1, 32>}, {pipeline_mode = #tpu.pipeline_mode<synchronous>, transform_indices = @transform_2, window_bounds = array<i64: 1, 32>}, {transform_indices = @transform_3, window_bounds = array<i64: 32, 32>}, {transform_indices = @transform_4, window_bounds = array<i64: 32, 32>}, {transform_indices = @transform_5, window_bounds = array<i64: 32, 32>}, {pipeline_mode = #tpu.pipeline_mode<synchronous>, transform_indices = @transform_6, window_bounds = array<i64: 1, 32>}, {pipeline_mode = #tpu.pipeline_mode<synchronous>, transform_indices = @transform_7, window_bounds = array<i64: 1, 32>}, {pipeline_mode = #tpu.pipeline_mode<synchronous>, transform_indices = @transform_8, window_bounds = array<i64: 1, 32>}, {transform_indices = @transform_9, window_bounds = array<i64: 128, 32>}, {transform_indices = @transform_10, window_bounds = array<i64: 128, 32>}, {transform_indices = @transform_11, window_bounds = array<i64: 128, 32>}]} {
    %c0_i32 = arith.constant 0 : i32
    %0 = arith.cmpi eq, %arg1, %c0_i32 : i32
    %1 = arith.extui %0 : i1 to i32
    %c0_i32_0 = arith.constant 0 : i32
    %2 = arith.cmpi ne, %1, %c0_i32_0 : i32
    scf.if %2 {
      %c0_24 = arith.constant 0 : index
      %c0_25 = arith.constant 0 : index
      %22 = vector.load %arg2[%c0_24, %c0_25] : memref<128x32xf32, #tpu.memory_space<vmem>>, vector<128x32xf32>
      %cst_26 = arith.constant dense<0.000000e+00> : vector<128xf32>
      %23 = vector.multi_reduction <add>, %22, %cst_26 [1] : vector<128x32xf32> to vector<128xf32>
      %24 = vector.shape_cast %23 : vector<128xf32> to vector<128x1xf32>
      %cst_27 = arith.constant 3.200000e+01 : f32
      %25 = vector.broadcast %cst_27 : f32 to vector<128x1xf32>
      %26 = arith.divf %24, %25 : vector<128x1xf32>
      %27 = vector.broadcast %26 : vector<128x1xf32> to vector<128x32xf32>
      %28 = arith.subf %22, %27 : vector<128x32xf32>
      %29 = arith.mulf %28, %28 : vector<128x32xf32>
      %cst_28 = arith.constant dense<0.000000e+00> : vector<128xf32>
      %30 = vector.multi_reduction <add>, %29, %cst_28 [1] : vector<128x32xf32> to vector<128xf32>
      %31 = vector.shape_cast %30 : vector<128xf32> to vector<128x1xf32>
      %cst_29 = arith.constant 3.200000e+01 : f32
      %32 = vector.broadcast %cst_29 : f32 to vector<128x1xf32>
      %33 = arith.divf %31, %32 : vector<128x1xf32>
      %34 = vector.broadcast %26 : vector<128x1xf32> to vector<128x32xf32>
      %35 = arith.subf %22, %34 : vector<128x32xf32>
      %cst_30 = arith.constant 9.99999974E-6 : f32
      %36 = vector.broadcast %cst_30 : f32 to vector<128x1xf32>
      %37 = arith.addf %33, %36 : vector<128x1xf32>
      %38 = math.rsqrt %37 : vector<128x1xf32>
      %39 = vector.broadcast %38 : vector<128x1xf32> to vector<128x32xf32>
      %40 = arith.mulf %35, %39 : vector<128x32xf32>
      %c0_31 = arith.constant 0 : index
      %c0_32 = arith.constant 0 : index
      %41 = vector.load %arg3[%c0_31, %c0_32] : memref<1x32xf32, #tpu.memory_space<vmem>>, vector<1x32xf32>
      %42 = vector.broadcast %41 : vector<1x32xf32> to vector<128x32xf32>
      %43 = arith.mulf %40, %42 : vector<128x32xf32>
      %c0_33 = arith.constant 0 : index
      %c0_34 = arith.constant 0 : index
      %44 = vector.load %arg4[%c0_33, %c0_34] : memref<1x32xf32, #tpu.memory_space<vmem>>, vector<1x32xf32>
      %45 = vector.broadcast %44 : vector<1x32xf32> to vector<128x32xf32>
      %46 = arith.addf %43, %45 : vector<128x32xf32>
      %c0_35 = arith.constant 0 : index
      %c0_36 = arith.constant 0 : index
      %47 = vector.load %arg14[%c0_35, %c0_36] : memref<128x32xf32, #tpu.memory_space<vmem>>, vector<128x32xf32>
      tpu.vector_store %arg14[%c0_35, %c0_36], %46 {strides = array<i32>} : memref<128x32xf32, #tpu.memory_space<vmem>>, vector<128x32xf32>,
      %cst_37 = arith.constant 0.000000e+00 : f32
      %48 = vector.broadcast %cst_37 : f32 to vector<128x32xf32>
      %c0_38 = arith.constant 0 : index
      %c0_39 = arith.constant 0 : index
      %49 = vector.load %arg15[%c0_38, %c0_39] : memref<128x32xf32, #tpu.memory_space<vmem>>, vector<128x32xf32>
      tpu.vector_store %arg15[%c0_38, %c0_39], %48 {strides = array<i32>} : memref<128x32xf32, #tpu.memory_space<vmem>>, vector<128x32xf32>,
      %cst_40 = arith.constant 0.000000e+00 : f32
      %50 = vector.broadcast %cst_40 : f32 to vector<128x32xf32>
      %c0_41 = arith.constant 0 : index
      %c0_42 = arith.constant 0 : index
      %51 = vector.load %arg16[%c0_41, %c0_42] : memref<128x32xf32, #tpu.memory_space<vmem>>, vector<128x32xf32>
      tpu.vector_store %arg16[%c0_41, %c0_42], %50 {strides = array<i32>} : memref<128x32xf32, #tpu.memory_space<vmem>>, vector<128x32xf32>,
      %cst_43 = arith.constant 0.000000e+00 : f32
      %52 = vector.broadcast %cst_43 : f32 to vector<128x32xf32>
      %c0_44 = arith.constant 0 : index
      %c0_45 = arith.constant 0 : index
      %53 = vector.load %arg17[%c0_44, %c0_45] : memref<128x32xf32, #tpu.memory_space<vmem>>, vector<128x32xf32>
      tpu.vector_store %arg17[%c0_44, %c0_45], %52 {strides = array<i32>} : memref<128x32xf32, #tpu.memory_space<vmem>>, vector<128x32xf32>,
    } else {
    }
    %c0 = arith.constant 0 : index
    %c0_1 = arith.constant 0 : index
    %3 = vector.load %arg14[%c0, %c0_1] : memref<128x32xf32, #tpu.memory_space<vmem>>, vector<128x32xf32>
    %c0_2 = arith.constant 0 : index
    %c0_3 = arith.constant 0 : index
    %4 = vector.load %arg15[%c0_2, %c0_3] : memref<128x32xf32, #tpu.memory_space<vmem>>, vector<128x32xf32>
    %c0_4 = arith.constant 0 : index
    %c0_5 = arith.constant 0 : index
    %5 = vector.load %arg5[%c0_4, %c0_5] : memref<32x32xf32, #tpu.memory_space<vmem>>, vector<32x32xf32>
    %cst = arith.constant dense<0.000000e+00> : vector<128x32xf32>
    %6 = tpu.matmul %3, %5, %cst {dimension_numbers = #tpu.dot_dimension_numbers<[1], [0], [0], [1], [0, 0, 1, 1], [], []>, precision = #tpu.contract_precision<fp32>} : vector<128x32xf32>, vector<32x32xf32>, vector<128x32xf32> -> vector<128x32xf32>
    %7 = arith.addf %4, %6 : vector<128x32xf32>
    %c0_6 = arith.constant 0 : index
    %c0_7 = arith.constant 0 : index
    %8 = vector.load %arg15[%c0_6, %c0_7] : memref<128x32xf32, #tpu.memory_space<vmem>>, vector<128x32xf32>
    tpu.vector_store %arg15[%c0_6, %c0_7], %7 {strides = array<i32>} : memref<128x32xf32, #tpu.memory_space<vmem>>, vector<128x32xf32>,
    %c0_8 = arith.constant 0 : index
    %c0_9 = arith.constant 0 : index
    %9 = vector.load %arg16[%c0_8, %c0_9] : memref<128x32xf32, #tpu.memory_space<vmem>>, vector<128x32xf32>
    %c0_10 = arith.constant 0 : index
    %c0_11 = arith.constant 0 : index
    %10 = vector.load %arg6[%c0_10, %c0_11] : memref<32x32xf32, #tpu.memory_space<vmem>>, vector<32x32xf32>
    %cst_12 = arith.constant dense<0.000000e+00> : vector<128x32xf32>
    %11 = tpu.matmul %3, %10, %cst_12 {dimension_numbers = #tpu.dot_dimension_numbers<[1], [0], [0], [1], [0, 0, 1, 1], [], []>, precision = #tpu.contract_precision<fp32>} : vector<128x32xf32>, vector<32x32xf32>, vector<128x32xf32> -> vector<128x32xf32>
    %12 = arith.addf %9, %11 : vector<128x32xf32>
    %c0_13 = arith.constant 0 : index
    %c0_14 = arith.constant 0 : index
    %13 = vector.load %arg16[%c0_13, %c0_14] : memref<128x32xf32, #tpu.memory_space<vmem>>, vector<128x32xf32>
    tpu.vector_store %arg16[%c0_13, %c0_14], %12 {strides = array<i32>} : memref<128x32xf32, #tpu.memory_space<vmem>>, vector<128x32xf32>,
    %c0_15 = arith.constant 0 : index
    %c0_16 = arith.constant 0 : index
    %14 = vector.load %arg17[%c0_15, %c0_16] : memref<128x32xf32, #tpu.memory_space<vmem>>, vector<128x32xf32>
    %c0_17 = arith.constant 0 : index
    %c0_18 = arith.constant 0 : index
    %15 = vector.load %arg7[%c0_17, %c0_18] : memref<32x32xf32, #tpu.memory_space<vmem>>, vector<32x32xf32>
    %cst_19 = arith.constant dense<0.000000e+00> : vector<128x32xf32>
    %16 = tpu.matmul %3, %15, %cst_19 {dimension_numbers = #tpu.dot_dimension_numbers<[1], [0], [0], [1], [0, 0, 1, 1], [], []>, precision = #tpu.contract_precision<fp32>} : vector<128x32xf32>, vector<32x32xf32>, vector<128x32xf32> -> vector<128x32xf32>
    %17 = arith.addf %14, %16 : vector<128x32xf32>
    %c0_20 = arith.constant 0 : index
    %c0_21 = arith.constant 0 : index
    %18 = vector.load %arg17[%c0_20, %c0_21] : memref<128x32xf32, #tpu.memory_space<vmem>>, vector<128x32xf32>
    tpu.vector_store %arg17[%c0_20, %c0_21], %17 {strides = array<i32>} : memref<128x32xf32, #tpu.memory_space<vmem>>, vector<128x32xf32>,
    %c0_i32_22 = arith.constant 0 : i32
    %19 = arith.cmpi eq, %arg1, %c0_i32_22 : i32
    %20 = arith.extui %19 : i1 to i32
    %c0_i32_23 = arith.constant 0 : i32
    %21 = arith.cmpi ne, %20, %c0_i32_23 : i32
    scf.if %21 {
      %c0_24 = arith.constant 0 : index
      %c0_25 = arith.constant 0 : index
      %22 = vector.load %arg15[%c0_24, %c0_25] : memref<128x32xf32, #tpu.memory_space<vmem>>, vector<128x32xf32>
      %c0_26 = arith.constant 0 : index
      %c0_27 = arith.constant 0 : index
      %23 = vector.load %arg8[%c0_26, %c0_27] : memref<1x32xf32, #tpu.memory_space<vmem>>, vector<1x32xf32>
      %24 = vector.broadcast %23 : vector<1x32xf32> to vector<128x32xf32>
      %25 = arith.addf %22, %24 : vector<128x32xf32>
      %c0_28 = arith.constant 0 : index
      %c0_29 = arith.constant 0 : index
      %26 = vector.load %arg11[%c0_28, %c0_29] : memref<128x32xf32, #tpu.memory_space<vmem>>, vector<128x32xf32>
      tpu.vector_store %arg11[%c0_28, %c0_29], %25 {strides = array<i32>} : memref<128x32xf32, #tpu.memory_space<vmem>>, vector<128x32xf32>,
      %c0_30 = arith.constant 0 : index
      %c0_31 = arith.constant 0 : index
      %27 = vector.load %arg16[%c0_30, %c0_31] : memref<128x32xf32, #tpu.memory_space<vmem>>, vector<128x32xf32>
      %c0_32 = arith.constant 0 : index
      %c0_33 = arith.constant 0 : index
      %28 = vector.load %arg9[%c0_32, %c0_33] : memref<1x32xf32, #tpu.memory_space<vmem>>, vector<1x32xf32>
      %29 = vector.broadcast %28 : vector<1x32xf32> to vector<128x32xf32>
      %30 = arith.addf %27, %29 : vector<128x32xf32>
      %c0_34 = arith.constant 0 : index
      %c0_35 = arith.constant 0 : index
      %31 = vector.load %arg12[%c0_34, %c0_35] : memref<128x32xf32, #tpu.memory_space<vmem>>, vector<128x32xf32>
      tpu.vector_store %arg12[%c0_34, %c0_35], %30 {strides = array<i32>} : memref<128x32xf32, #tpu.memory_space<vmem>>, vector<128x32xf32>,
      %c0_36 = arith.constant 0 : index
      %c0_37 = arith.constant 0 : index
      %32 = vector.load %arg17[%c0_36, %c0_37] : memref<128x32xf32, #tpu.memory_space<vmem>>, vector<128x32xf32>
      %c0_38 = arith.constant 0 : index
      %c0_39 = arith.constant 0 : index
      %33 = vector.load %arg10[%c0_38, %c0_39] : memref<1x32xf32, #tpu.memory_space<vmem>>, vector<1x32xf32>
      %34 = vector.broadcast %33 : vector<1x32xf32> to vector<128x32xf32>
      %35 = arith.addf %32, %34 : vector<128x32xf32>
      %c0_40 = arith.constant 0 : index
      %c0_41 = arith.constant 0 : index
      %36 = vector.load %arg13[%c0_40, %c0_41] : memref<128x32xf32, #tpu.memory_space<vmem>>, vector<128x32xf32>
      tpu.vector_store %arg13[%c0_40, %c0_41], %35 {strides = array<i32>} : memref<128x32xf32, #tpu.memory_space<vmem>>, vector<128x32xf32>,
    } else {
    }
    return
  }
  func.func @transform_0(%arg0: i32, %arg1: i32) -> (i32, i32) {
    %c0_i32 = arith.constant 0 : i32
    %c0_i32_0 = arith.constant 0 : i32
    return %arg0, %c0_i32 : i32, i32
  }
  func.func @transform_1(%arg0: i32, %arg1: i32) -> (i32, i32) {
    %c0_i32 = arith.constant 0 : i32
    %c0_i32_0 = arith.constant 0 : i32
    %c0_i32_1 = arith.constant 0 : i32
    return %c0_i32, %c0_i32_0 : i32, i32
  }
  func.func @transform_2(%arg0: i32, %arg1: i32) -> (i32, i32) {
    %c0_i32 = arith.constant 0 : i32
    %c0_i32_0 = arith.constant 0 : i32
    %c0_i32_1 = arith.constant 0 : i32
    return %c0_i32, %c0_i32_0 : i32, i32
  }
  func.func @transform_3(%arg0: i32, %arg1: i32) -> (i32, i32) {
    %c0_i32 = arith.constant 0 : i32
    %c0_i32_0 = arith.constant 0 : i32
    return %arg1, %c0_i32 : i32, i32
  }
  func.func @transform_4(%arg0: i32, %arg1: i32) -> (i32, i32) {
    %c0_i32 = arith.constant 0 : i32
    %c0_i32_0 = arith.constant 0 : i32
    return %arg1, %c0_i32 : i32, i32
  }
  func.func @transform_5(%arg0: i32, %arg1: i32) -> (i32, i32) {
    %c0_i32 = arith.constant 0 : i32
    %c0_i32_0 = arith.constant 0 : i32
    return %arg1, %c0_i32 : i32, i32
  }
  func.func @transform_6(%arg0: i32, %arg1: i32) -> (i32, i32) {
    %c0_i32 = arith.constant 0 : i32
    %c0_i32_0 = arith.constant 0 : i32
    %c0_i32_1 = arith.constant 0 : i32
    return %c0_i32, %c0_i32_0 : i32, i32
  }
  func.func @transform_7(%arg0: i32, %arg1: i32) -> (i32, i32) {
    %c0_i32 = arith.constant 0 : i32
    %c0_i32_0 = arith.constant 0 : i32
    %c0_i32_1 = arith.constant 0 : i32
    return %c0_i32, %c0_i32_0 : i32, i32
  }
  func.func @transform_8(%arg0: i32, %arg1: i32) -> (i32, i32) {
    %c0_i32 = arith.constant 0 : i32
    %c0_i32_0 = arith.constant 0 : i32
    %c0_i32_1 = arith.constant 0 : i32
    return %c0_i32, %c0_i32_0 : i32, i32
  }
  func.func @transform_9(%arg0: i32, %arg1: i32) -> (i32, i32) {
    %c0_i32 = arith.constant 0 : i32
    %c0_i32_0 = arith.constant 0 : i32
    return %arg0, %c0_i32 : i32, i32
  }
  func.func @transform_10(%arg0: i32, %arg1: i32) -> (i32, i32) {
    %c0_i32 = arith.constant 0 : i32
    %c0_i32_0 = arith.constant 0 : i32
    return %arg0, %c0_i32 : i32, i32
  }
  func.func @transform_11(%arg0: i32, %arg1: i32) -> (i32, i32) {
    %c0_i32 = arith.constant 0 : i32
    %c0_i32_0 = arith.constant 0 : i32
    return %arg0, %c0_i32 : i32, i32
  }
}

</mosaic_0001>

<bundles_post_ra>
// kernel: tpu_custom_call.1
= control target key start
LH: loop header
LB: loop body
LE: loop exit
PB: predicated region body
PF: predicated region fallthrough
CT: control target
= control target key end

     0   :  { %17 = vsyncpa [#allocation7], 0  ;;  %s7255_s0 = inlined_call_operand.hbm [shape: f32[128,32], index: 0, kind: input, shape index: {}]   ;;  %s7256_s1 = inlined_call_operand.hbm [shape: f32[1,32], index: 1, kind: input, shape index: {}]   ;;  %s7257_s2 = inlined_call_operand.hbm [shape: f32[1,32], index: 2, kind: input, shape index: {}]   ;;  %s7258_s3 = inlined_call_operand.hbm [shape: f32[32,32], index: 3, kind: input, shape index: {}]   ;;  %s7259_s4 = inlined_call_operand.hbm [shape: f32[32,32], index: 4, kind: input, shape index: {}]   ;;  %s7260_s5 = inlined_call_operand.hbm [shape: f32[32,32], index: 5, kind: input, shape index: {}]   ;;  %s7261_s6 = inlined_call_operand.hbm [shape: f32[1,32], index: 6, kind: input, shape index: {}]   ;;  %s7262_s7 = inlined_call_operand.hbm [shape: f32[1,32], index: 7, kind: input, shape index: {}]   ;;  %s7263_s8 = inlined_call_operand.hbm [shape: f32[1,32], index: 8, kind: input, shape index: {}]   ;;  %s7264_s9 = inlined_call_operand.hbm [shape: f32[128,32], index: 9, kind: output, shape index: {0}]   ;;  %s7265_s10 = inlined_call_operand.hbm [shape: f32[128,32], index: 10, kind: output, shape index: {1}]   ;;  %s7266_s11 = inlined_call_operand.hbm [shape: f32[128,32], index: 11, kind: output, shape index: {2}]  }
   0x1   :  { %18 = vsyncpa [#allocation10], 0 }
   0x2   :  { %19 = vsyncpa [#allocation13], 0 }
   0x3   :  { %20 = vsyncpa [#allocation16], 0 }
   0x4   :  { %21 = vsyncpa [#allocation19], 0 }
   0x5   :  { %22 = vsyncpa [#allocation8], 0 }
   0x6   :  { %23 = vsyncpa [#allocation23], 0  ;;  %s5970_s17 = smov [#allocation9]   ;;  %s5692_s21 = scalar_lea.hbm %s7256_s1, 16 }
   0x7   :  { %s42_s18 = sshll.u32 %s5970_s17, 4  ;;  %p5693_p0 = scmp.ne.s32.totalorder %s7256_s1, %s5692_s21  ;;  %s43_s18 = int_to_ptr.vmem [resolvable:$true] %s42_s18 }
   0x8   :  { %p5696_p1 = scmp.lt.u32.totalorder %s5692_s21, %s7256_s1 }
   0xa   :  { %p5698_p2 = pnand %p5696_p1, %p5693_p0 }
   0xc   :  { %5701 = shalt.err (!%p5698_p2)
}
   0xd   :  { %s5702_s26 = scalar_lea.vmem %s43_s18, 16  ;;  %s5706_s27 = scalar_lea.vmem %s43_s18, 32 }
   0xe   :  { %p5703_p3 = scmp.ne.s32.totalorder %s43_s18, %s5702_s26  ;;  %p5707_p4 = scmp.lt.s32.totalorder %s43_s18, %s43_s18 }
   0xf   :  { %p5708_p5 = scmp.lt.s32.totalorder %s5706_s27, %s5702_s26 }
  0x11   :  { %p5709_p6 = por %p5708_p5, %p5707_p4 }
  0x13   :  { %p5710_p7 = pnand %p5709_p6, %p5703_p3 }
  0x15   :  { %5713 = shalt.err (!%p5710_p7)
}
  0x16   :  { %45 = dma.hbm_to_vmem [thread:$0]  %s7256_s1, 16, %s43_s18, [#allocation10]  }
  0x17   :  { %s5971_s30 = smov [#allocation12]   ;;  %s5972_s13 = smov [#allocation15]  }
  0x18   :  { %s61_s12 = sshll.u32 %s5971_s30, 4  ;;  %s85_s14 = sshll.u32 %s5972_s13, 4  ;;  %s62_s12 = int_to_ptr.vmem [resolvable:$true] %s61_s12  ;;  %s86_s14 = int_to_ptr.vmem [resolvable:$true] %s85_s14 }
  0x19   :  { %s5714_s17 = scalar_lea.hbm %s7258_s3, 512 }
  0x1a   :  { %p5715_p8 = scmp.ne.s32.totalorder %s7258_s3, %s5714_s17  ;;  %p5718_p9 = scmp.lt.u32.totalorder %s5714_s17, %s7258_s3 }
  0x1c   :  { %p5720_p10 = pnand %p5718_p9, %p5715_p8 }
  0x1e   :  { %5723 = shalt.err (!%p5720_p10)
}
  0x1f   :  { %s5724_s1 = scalar_lea.vmem %s62_s12, 512  ;;  %p5729_p12 = scmp.lt.s32.totalorder %s62_s12, %s62_s12 }
  0x20   :  { %p5725_p11 = scmp.ne.s32.totalorder %s62_s12, %s5724_s1  ;;  %p5730_p13 = scmp.lt.s32.totalorder %s5724_s1, %s5724_s1 }
  0x22   :  { %p5731_p0 = por %p5730_p13, %p5729_p12 }
  0x24   :  { %p5732_p1 = pnand %p5731_p0, %p5725_p11 }
  0x26   :  { %5735 = shalt.err (!%p5732_p1)
}
  0x27   :  { %s5973_s18 = smov 128   ;;  %s5974_s23 = smov 8  }
  0x28   :  { %67 = dma.hbm_to_vmem [thread:$0]  %s7258_s3, 512, %s62_s12, [#allocation13], %s5973_s18, %s5973_s18, %s5974_s23  }
  0x29   :  { %s5736_s28 = scalar_lea.hbm %s7260_s5, 512 }
  0x2a   :  { %p5737_p2 = scmp.ne.s32.totalorder %s7260_s5, %s5736_s28  ;;  %p5740_p3 = scmp.lt.u32.totalorder %s5736_s28, %s7260_s5 }
  0x2c   :  { %p5742_p4 = pnand %p5740_p3, %p5737_p2 }
  0x2e   :  { %5745 = shalt.err (!%p5742_p4)
}
  0x2f   :  { %s5746_s16 = scalar_lea.vmem %s86_s14, 512  ;;  %p5751_p6 = scmp.lt.s32.totalorder %s86_s14, %s86_s14 }
  0x30   :  { %p5747_p5 = scmp.ne.s32.totalorder %s86_s14, %s5746_s16  ;;  %p5752_p7 = scmp.lt.s32.totalorder %s5746_s16, %s5746_s16 }
  0x32   :  { %p5753_p8 = por %p5752_p7, %p5751_p6 }
  0x34   :  { %p5754_p9 = pnand %p5753_p8, %p5747_p5 }
  0x36   :  { %5757 = shalt.err (!%p5754_p9)
}
  0x37   :  { %91 = dma.hbm_to_vmem [thread:$0]  %s7260_s5, 512, %s86_s14, [#allocation16], %s5973_s18, %s5973_s18, %s5974_s23  }
  0x38   :  { %s5975_s17 = smov [#allocation18]   ;;  %s5976_s20 = smov [#allocation6]  }
  0x39   :  { %s108_s19 = sshll.u32 %s5975_s17, 4  ;;  %s29_s21 = sshll.u32 %s5976_s20, 4  ;;  %s109_s19 = int_to_ptr.vmem [resolvable:$true] %s108_s19  ;;  %s30_s21 = int_to_ptr.vmem [resolvable:$true] %s29_s21 }
  0x3a   :  { %s5758_s24 = scalar_lea.hbm %s7262_s7, 16 }
  0x3b   :  { %p5759_p10 = scmp.ne.s32.totalorder %s7262_s7, %s5758_s24  ;;  %p5762_p11 = scmp.lt.u32.totalorder %s5758_s24, %s7262_s7 }
  0x3d   :  { %p5764_p12 = pnand %p5762_p11, %p5759_p10 }
  0x3f   :  { %5767 = shalt.err (!%p5764_p12)
}
  0x40   :  { %s5768_s5 = scalar_lea.vmem %s109_s19, 16  ;;  %s5772_s14 = scalar_lea.vmem %s109_s19, 32 }
  0x41   :  { %p5769_p13 = scmp.ne.s32.totalorder %s109_s19, %s5768_s5  ;;  %p5773_p0 = scmp.lt.s32.totalorder %s109_s19, %s109_s19 }
  0x42   :  { %p5774_p1 = scmp.lt.s32.totalorder %s5772_s14, %s5768_s5 }
  0x44   :  { %p5775_p2 = por %p5774_p1, %p5773_p0 }
  0x46   :  { %p5776_p3 = pnand %p5775_p2, %p5769_p13 }
  0x48   :  { %5779 = shalt.err (!%p5776_p3)
}
  0x49   :  { %111 = dma.hbm_to_vmem [thread:$0]  %s7262_s7, 16, %s109_s19, [#allocation19]  }
  0x4a   :  { %s5780_s16 = scalar_lea.hbm %s7255_s0, 2048 }
  0x4b   :  { %p5781_p4 = scmp.ne.s32.totalorder %s7255_s0, %s5780_s16  ;;  %p5784_p5 = scmp.lt.u32.totalorder %s5780_s16, %s7255_s0 }
  0x4d   :  { %p5786_p6 = pnand %p5784_p5, %p5781_p4 }
  0x4f   :  { %5789 = shalt.err (!%p5786_p6)
}
  0x50   :  { %s5790_s22 = scalar_lea.vmem %s30_s21, 2048  ;;  %p5795_p8 = scmp.lt.s32.totalorder %s30_s21, %s30_s21 }
  0x51   :  { %p5791_p7 = scmp.ne.s32.totalorder %s30_s21, %s5790_s22  ;;  %p5796_p9 = scmp.lt.s32.totalorder %s5790_s22, %s5790_s22 }
  0x53   :  { %p5797_p10 = por %p5796_p9, %p5795_p8 }
  0x55   :  { %p5798_p11 = pnand %p5797_p10, %p5791_p7 }
  0x57   :  { %5801 = shalt.err (!%p5798_p11)
}
  0x58   :  { %35 = dma.hbm_to_vmem [thread:$0]  %s7255_s0, 2048, %s30_s21, [#allocation7], %s5973_s18, %s5973_s18, %s5974_s23  }
  0x59   :  { %s5977_s1 = smov [#allocation11]   ;;  %s5978_s25 = smov [#allocation14]  }
  0x5a   :  { %s52_s24 = sshll.u32 %s5977_s1, 4  ;;  %s73_s26 = sshll.u32 %s5978_s25, 4  ;;  %s53_s24 = int_to_ptr.vmem [resolvable:$true] %s52_s24  ;;  %s74_s26 = int_to_ptr.vmem [resolvable:$true] %s73_s26 }
  0x5b   :  { %s5802_s5 = scalar_lea.hbm %s7257_s2, 16 }
  0x5c   :  { %p5803_p12 = scmp.ne.s32.totalorder %s7257_s2, %s5802_s5  ;;  %p5806_p13 = scmp.lt.u32.totalorder %s5802_s5, %s7257_s2 }
  0x5e   :  { %p5808_p0 = pnand %p5806_p13, %p5803_p12 }
  0x60   :  { %5811 = shalt.err (!%p5808_p0)
}
  0x61   :  { %s5812_s0 = scalar_lea.vmem %s53_s24, 16  ;;  %s5816_s21 = scalar_lea.vmem %s53_s24, 32 }
  0x62   :  { %p5813_p1 = scmp.ne.s32.totalorder %s53_s24, %s5812_s0  ;;  %p5817_p2 = scmp.lt.s32.totalorder %s53_s24, %s53_s24 }
  0x63   :  { %p5818_p3 = scmp.lt.s32.totalorder %s5816_s21, %s5812_s0 }
  0x65   :  { %p5819_p4 = por %p5818_p3, %p5817_p2 }
  0x67   :  { %p5820_p5 = pnand %p5819_p4, %p5813_p1 }
  0x69   :  { %5823 = shalt.err (!%p5820_p5)
}
  0x6a   :  { %55 = dma.hbm_to_vmem [thread:$0]  %s7257_s2, 16, %s53_s24, [#allocation10]  }
  0x6b   :  { %s5824_s17 = scalar_lea.hbm %s7259_s4, 512 }
  0x6c   :  { %p5825_p6 = scmp.ne.s32.totalorder %s7259_s4, %s5824_s17  ;;  %p5828_p7 = scmp.lt.u32.totalorder %s5824_s17, %s7259_s4 }
  0x6e   :  { %p5830_p8 = pnand %p5828_p7, %p5825_p6 }
  0x70   :  { %5833 = shalt.err (!%p5830_p8)
}
  0x71   :  { %s5834_s1 = scalar_lea.vmem %s74_s26, 512  ;;  %p5839_p10 = scmp.lt.s32.totalorder %s74_s26, %s74_s26 }
  0x72   :  { %p5835_p9 = scmp.ne.s32.totalorder %s74_s26, %s5834_s1  ;;  %p5840_p11 = scmp.lt.s32.totalorder %s5834_s1, %s5834_s1 }
  0x74   :  { %p5841_p12 = por %p5840_p11, %p5839_p10 }
  0x76   :  { %p5842_p13 = pnand %p5841_p12, %p5835_p9 }
  0x78   :  { %5845 = shalt.err (!%p5842_p13)
}
  0x79   :  { %79 = dma.hbm_to_vmem [thread:$0]  %s7259_s4, 512, %s74_s26, [#allocation13], %s5973_s18, %s5973_s18, %s5974_s23  }
  0x7a   :  { %s5979_s25 = smov [#allocation17]   ;;  %s5980_s28 = smov [#allocation20]  }
  0x7b   :  { %s98_s27 = sshll.u32 %s5979_s25, 4  ;;  %s118_s5 = sshll.u32 %s5980_s28, 4  ;;  %s99_s27 = int_to_ptr.vmem [resolvable:$true] %s98_s27  ;;  %s119_s5 = int_to_ptr.vmem [resolvable:$true] %s118_s5 }
  0x7c   :  { %s5846_s30 = scalar_lea.hbm %s7261_s6, 16 }
  0x7d   :  { %p5847_p0 = scmp.ne.s32.totalorder %s7261_s6, %s5846_s30  ;;  %p5850_p1 = scmp.lt.u32.totalorder %s5846_s30, %s7261_s6 }
  0x7f   :  { %p5852_p2 = pnand %p5850_p1, %p5847_p0 }
  0x81   :  { %5855 = shalt.err (!%p5852_p2)
}
  0x82   :  { %s5856_s4 = scalar_lea.vmem %s99_s27, 16  ;;  %s5860_s26 = scalar_lea.vmem %s99_s27, 32 }
  0x83   :  { %p5857_p3 = scmp.ne.s32.totalorder %s99_s27, %s5856_s4  ;;  %p5861_p4 = scmp.lt.s32.totalorder %s99_s27, %s99_s27 }
  0x84   :  { %p5862_p5 = scmp.lt.s32.totalorder %s5860_s26, %s5856_s4 }
  0x86   :  { %p5863_p6 = por %p5862_p5, %p5861_p4 }
  0x88   :  { %p5864_p7 = pnand %p5863_p6, %p5857_p3 }
  0x8a   :  { %5867 = shalt.err (!%p5864_p7)
}
  0x8b   :  { %101 = dma.hbm_to_vmem [thread:$0]  %s7261_s6, 16, %s99_s27, [#allocation16]  }
  0x8c   :  { %s5868_s20 = scalar_lea.hbm %s7263_s8, 16 }
  0x8d   :  { %p5869_p8 = scmp.ne.s32.totalorder %s7263_s8, %s5868_s20  ;;  %p5872_p9 = scmp.lt.u32.totalorder %s5868_s20, %s7263_s8 }
  0x8f   :  { %p5874_p10 = pnand %p5872_p9, %p5869_p8 }
  0x91   :  { %5877 = shalt.err (!%p5874_p10)
}
  0x92   :  { %s5878_s2 = scalar_lea.vmem %s119_s5, 16  ;;  %s5882_s24 = scalar_lea.vmem %s119_s5, 32 }
  0x93   :  { %p5879_p11 = scmp.ne.s32.totalorder %s119_s5, %s5878_s2  ;;  %p5883_p12 = scmp.lt.s32.totalorder %s119_s5, %s119_s5 }
  0x94   :  { %p5884_p13 = scmp.lt.s32.totalorder %s5882_s24, %s5878_s2 }
  0x96   :  { %p5885_p0 = por %p5884_p13, %p5883_p12 }
  0x98   :  { %p5886_p1 = pnand %p5885_p0, %p5879_p11 }
  0x9a   :  { %5889 = shalt.err (!%p5886_p1)
}
  0x9b   :  { %121 = dma.hbm_to_vmem [thread:$0]  %s7263_s8, 16, %s119_s5, [#allocation19]  }
  0x9c   :  { %5956 = dma.done.wait [#allocation7], 2048  }
  0x9d   :  { %5957 = vsyncadd [#allocation7], 4294965248 }
  0x9e   :  { %5958 = dma.done.wait [#allocation10], 32  }
  0x9f   :  { %5959 = vsyncadd [#allocation10], 4294967264 }
  0xa0   :  { %5960 = dma.done.wait [#allocation13], 1024  }
  0xa1   :  { %5961 = vsyncadd [#allocation13], 4294966272 }
  0xa2   :  { %5962 = dma.done.wait [#allocation16], 528  }
  0xa3   :  { %5963 = vsyncadd [#allocation16], 4294966768 }
  0xa4   :  { %5964 = dma.done.wait [#allocation19], 32  }
  0xa5   :  { %5965 = vsyncadd [#allocation19], 4294967264  ;;  %vm169_vm0 = vcmask 261120   ;;  %v153_v0 = vld [vmem:[#allocation6] sm:$0xff]  ;;  %v155_v1 = vld [vmem:[#allocation6 + $0x10] sm:$0xff]  ;;  %s5982_s8 = smov [#allocation21]  }
  0xa6   :  { %v154_v2 = vld [vmem:[#allocation6 + $0x8] sm:$0xff]  ;;  %v170_v3 = vsel %vm169_vm0, %v153_v0, 0.0  ;;  %v176_v4 = vsel %vm169_vm0, %v155_v1, 0.0  ;;  %v156_v5 = vld [vmem:[#allocation6 + $0x18] sm:$0xff]  ;;  %v157_v8 = vld [vmem:[#allocation6 + $0x20] sm:$0xff]  ;;  %s4273_s27 = sshll.u32 %s5982_s8, 4  ;;  %s4274_s27 = int_to_ptr.vmem [resolvable:$true] %s4273_s27 }
  0xa7   :  { %171 = vadd.xlane.f32.xlu0 %v170_v3  ;;  %177 = vadd.xlane.f32.xlu1 %v176_v4  ;;  %v173_v6 = vsel %vm169_vm0, %v154_v2, 0.0  ;;  %v179_v7 = vsel %vm169_vm0, %v156_v5, 0.0  ;;  %v158_v9 = vld [vmem:[#allocation6 + $0x28] sm:$0xff]  ;;  %v182_v10 = vsel %vm169_vm0, %v157_v8, 0.0  ;;  %v6171_v12 = vld [vmem:[#allocation6 + $0x30] sm:$0xff]  ;;  %v6173_v13 = vld [vmem:[#allocation6 + $0x38] sm:$0xff]  ;;  %p5895_p3 = scmp.lt.s32.totalorder %s4274_s27, %s4274_s27 }
  0xa8   :  { %v185_v11 = vsel %vm169_vm0, %v158_v9, 0.0  ;;  %v188_v14 = vsel %vm169_vm0, %v6171_v12, 0.0  ;;  %v191_v15 = vsel %vm169_vm0, %v6173_v13, 0.0  ;;  %v6179_v16 = vld [vmem:[#allocation6 + $0x40] sm:$0xff]  ;;  %v6181_v17 = vld [vmem:[#allocation6 + $0x48] sm:$0xff]  ;;  %v6187_v20 = vld [vmem:[#allocation6 + $0x50] sm:$0xff] }
  0xa9   :  { %v194_v18 = vsel %vm169_vm0, %v6179_v16, 0.0  ;;  %v197_v19 = vsel %vm169_vm0, %v6181_v17, 0.0  ;;  %v6189_v21 = vld [vmem:[#allocation6 + $0x58] sm:$0xff]  ;;  %v200_v22 = vsel %vm169_vm0, %v6187_v20, 0.0  ;;  %v6195_v24 = vld [vmem:[#allocation6 + $0x60] sm:$0xff]  ;;  %v6197_v25 = vld [vmem:[#allocation6 + $0x68] sm:$0xff] }
  0xaa   :  { %v203_v23 = vsel %vm169_vm0, %v6189_v21, 0.0  ;;  %v206_v26 = vsel %vm169_vm0, %v6195_v24, 0.0  ;;  %v209_v27 = vsel %vm169_vm0, %v6197_v25, 0.0  ;;  %v6203_v28 = vld [vmem:[#allocation6 + $0x70] sm:$0xff]  ;;  %v6205_v29 = vld [vmem:[#allocation6 + $0x78] sm:$0xff]  ;;  %s5890_s28 = scalar_lea.vmem %s4274_s27, 2048 }
  0xab   :  { %174 = vadd.xlane.f32.xlu0 %v173_v6  ;;  %180 = vadd.xlane.f32.xlu1 %v179_v7  ;;  %v212_v30 = vsel %vm169_vm0, %v6203_v28, 0.0  ;;  %v215_v31 = vsel %vm169_vm0, %v6205_v29, 0.0  ;;  %p5891_p2 = scmp.ne.s32.totalorder %s4274_s27, %s5890_s28  ;;  %p5896_p4 = scmp.lt.s32.totalorder %s5890_s28, %s5890_s28 }
  0xad   :  { %p5897_p5 = por %p5896_p4, %p5895_p3 }
  0xaf   :  { %183 = vadd.xlane.f32.xlu0 %v182_v10  ;;  %186 = vadd.xlane.f32.xlu1 %v185_v11  ;;  %p5898_p6 = pnand %p5897_p5, %p5891_p2 }
  0xb3   :  { %189 = vadd.xlane.f32.xlu0 %v188_v14  ;;  %192 = vadd.xlane.f32.xlu1 %v191_v15 }
  0xb7   :  { %195 = vadd.xlane.f32.xlu0 %v194_v18  ;;  %198 = vadd.xlane.f32.xlu1 %v197_v19 }
  0xbb   :  { %201 = vadd.xlane.f32.xlu0 %v200_v22  ;;  %204 = vadd.xlane.f32.xlu1 %v203_v23 }
  0xbf   :  { %207 = vadd.xlane.f32.xlu0 %v206_v26  ;;  %210 = vadd.xlane.f32.xlu1 %v209_v27 }
  0xc3   :  { %213 = vadd.xlane.f32.xlu0 %v212_v30  ;;  %216 = vadd.xlane.f32.xlu1 %v215_v31 }
 0x134   :  { %v172_v32 = vpop.xlane.xlu0 %171  ;;  %v178_v33 = vpop.xlane.xlu1 %177 }
 0x135   :  { %v219_v34 = vmul.f32 0.03125, %v172_v32  ;;  %v221_v35 = vmul.f32 0.03125, %v178_v33 }
 0x137   :  { %v6211_v36 = vsub.f32 %v153_v0, %v219_v34  ;;  %v6213_v37 = vsub.f32 %v155_v1, %v221_v35 }
 0x138   :  { %v175_v38 = vpop.xlane.xlu0 %174  ;;  %v181_v39 = vpop.xlane.xlu1 %180 }
 0x139   :  { %v220_v40 = vmul.f32 0.03125, %v175_v38  ;;  %v222_v41 = vmul.f32 0.03125, %v181_v39  ;;  %v251_v42 = vmul.f32 %v6211_v36, %v6211_v36  ;;  %v253_v43 = vmul.f32 %v6213_v37, %v6213_v37 }
 0x13b   :  { %v6219_v44 = vsub.f32 %v154_v2, %v220_v40  ;;  %v6221_v45 = vsub.f32 %v156_v5, %v222_v41  ;;  %v267_v46 = vsel %vm169_vm0, %v251_v42, 0.0  ;;  %v273_v49 = vsel %vm169_vm0, %v253_v43, 0.0 }
 0x13c   :  { %268 = vadd.xlane.f32.xlu0 %v267_v46  ;;  %v184_v47 = vpop.xlane.xlu0 %183  ;;  %v187_v48 = vpop.xlane.xlu1 %186 }
 0x13d   :  { %v223_v50 = vmul.f32 0.03125, %v184_v47  ;;  %v224_v51 = vmul.f32 0.03125, %v187_v48  ;;  %v252_v52 = vmul.f32 %v6219_v44, %v6219_v44  ;;  %v254_v53 = vmul.f32 %v6221_v45, %v6221_v45 }
 0x13f   :  { %v6229_v54 = vsub.f32 %v157_v8, %v223_v50  ;;  %v6231_v55 = vsub.f32 %v158_v9, %v224_v51  ;;  %v270_v56 = vsel %vm169_vm0, %v252_v52, 0.0  ;;  %v276_v59 = vsel %vm169_vm0, %v254_v53, 0.0  ;;  %v522_v53 = vld [vmem:[#allocation12 + $0x8] sm:$0xff] }
 0x140   :  { %274 = vadd.xlane.f32.xlu0 %v273_v49  ;;  %271 = vadd.xlane.f32.xlu1 %v270_v56  ;;  %v190_v57 = vpop.xlane.xlu0 %189  ;;  %v193_v58 = vpop.xlane.xlu1 %192 }
 0x141   :  { %v225_v60 = vmul.f32 0.03125, %v190_v57  ;;  %v226_v61 = vmul.f32 0.03125, %v193_v58  ;;  %v255_v62 = vmul.f32 %v6229_v54, %v6229_v54  ;;  %v256_v63 = vmul.f32 %v6231_v55, %v6231_v55 }
 0x142   :  { %v578_v57 = vand.u32 4294901760, %v522_v53 }
 0x143   :  { %v6240_v0 = vsub.f32 %v6171_v12, %v225_v60  ;;  %v6243_v1 = vsub.f32 %v6173_v13, %v226_v61  ;;  %v279_v2 = vsel %vm169_vm0, %v255_v62, 0.0  ;;  %v282_v5 = vsel %vm169_vm0, %v256_v63, 0.0  ;;  %v524_v60 = vld [vmem:[#allocation12 + $0x18] sm:$0xff] }
 0x144   :  { %277 = vadd.xlane.f32.xlu1 %v276_v59  ;;  %280 = vadd.xlane.f32.xlu0 %v279_v2  ;;  %v196_v3 = vpop.xlane.xlu0 %195  ;;  %v199_v4 = vpop.xlane.xlu1 %198  ;;  %v523_v59 = vld [vmem:[#allocation12 + $0x10] sm:$0xff]  ;;  %v584_v62 = vand.u32 4294901760, %v524_v60 }
 0x145   :  { %v227_v6 = vmul.f32 0.03125, %v196_v3  ;;  %v228_v7 = vmul.f32 0.03125, %v199_v4  ;;  %v257_v8 = vmul.f32 %v6240_v0, %v6240_v0  ;;  %v258_v9 = vmul.f32 %v6243_v1, %v6243_v1 }
 0x146   :  { %v581_v61 = vand.u32 4294901760, %v523_v59  ;;  %v812_v3 = vsub.f32 %v522_v53, %v578_v57 }
 0x147   :  { %v6252_v10 = vsub.f32 %v6179_v16, %v227_v6  ;;  %v6255_v11 = vsub.f32 %v6181_v17, %v228_v7  ;;  %v285_v12 = vsel %vm169_vm0, %v257_v8, 0.0  ;;  %v288_v15 = vsel %vm169_vm0, %v258_v9, 0.0 }
 0x148   :  { %283 = vadd.xlane.f32.xlu1 %v282_v5  ;;  %286 = vadd.xlane.f32.xlu0 %v285_v12  ;;  %v202_v13 = vpop.xlane.xlu0 %201  ;;  %v205_v14 = vpop.xlane.xlu1 %204  ;;  %v6307_v63 = vpack.c.bf16 %v584_v62, %v581_v61  ;;  %v813_v5 = vand.u32 4294901760, %v812_v3 }
 0x149   :  { %v229_v18 = vmul.f32 0.03125, %v202_v13  ;;  %v230_v19 = vmul.f32 0.03125, %v205_v14  ;;  %v259_v22 = vmul.f32 %v6252_v10, %v6252_v10  ;;  %v260_v16 = vmul.f32 %v6255_v11, %v6255_v11 }
 0x14a   :  { %v814_v7 = vsub.f32 %v812_v3, %v813_v5  ;;  %v819_v13 = vsub.f32 %v523_v59, %v581_v61  ;;  %v826_v14 = vsub.f32 %v524_v60, %v584_v62  ;;  %v6327_v59 = vld [vmem:[#allocation9] ss:$0 sm:$0xff] }
 0x14b   :  { %v6264_v23 = vsub.f32 %v6187_v20, %v229_v18  ;;  %v6267_v17 = vsub.f32 %v6189_v21, %v230_v19  ;;  %v291_v26 = vsel %vm169_vm0, %v259_v22, 0.0  ;;  %v294_v31 = vsel %vm169_vm0, %v260_v16, 0.0 }
 0x14c   :  { %289 = vadd.xlane.f32.xlu1 %v288_v15  ;;  %292 = vadd.xlane.f32.xlu0 %v291_v26  ;;  %v208_v27 = vpop.xlane.xlu0 %207  ;;  %v211_v30 = vpop.xlane.xlu1 %210  ;;  %v815_v12 = vand.u32 4294901760, %v814_v7  ;;  %v820_v18 = vand.u32 4294901760, %v819_v13  ;;  %v827_v19 = vand.u32 4294901760, %v826_v14 }
 0x14d   :  { %v231_v32 = vmul.f32 0.03125, %v208_v27  ;;  %v232_v33 = vmul.f32 0.03125, %v211_v30  ;;  %v261_v34 = vmul.f32 %v6264_v23, %v6264_v23  ;;  %v262_v20 = vmul.f32 %v6267_v17, %v6267_v17 }
 0x14e   :  { %v821_v22 = vsub.f32 %v819_v13, %v820_v18  ;;  %v828_v16 = vsub.f32 %v826_v14, %v827_v19  ;;  %v6319_v26 = vpack.c.bf16 %v827_v19, %v820_v18 }
 0x14f   :  { %v6276_v35 = vsub.f32 %v6195_v24, %v231_v32  ;;  %v6279_v21 = vsub.f32 %v6197_v25, %v232_v33  ;;  %v297_v38 = vsel %vm169_vm0, %v261_v34, 0.0  ;;  %v300_v41 = vsel %vm169_vm0, %v262_v20, 0.0 }
 0x150   :  { %295 = vadd.xlane.f32.xlu1 %v294_v31  ;;  %298 = vadd.xlane.f32.xlu0 %v297_v38  ;;  %v214_v39 = vpop.xlane.xlu0 %213  ;;  %v217_v40 = vpop.xlane.xlu1 %216  ;;  %v822_v27 = vand.u32 4294901760, %v821_v22  ;;  %v829_v30 = vand.u32 4294901760, %v828_v16  ;;  %v6325_v33 = vpack.c.bf16 %v826_v14, %v819_v13 }
 0x151   :  { %v233_v42 = vmul.f32 0.03125, %v214_v39  ;;  %v234_v43 = vmul.f32 0.03125, %v217_v40  ;;  %v263_v46 = vmul.f32 %v6276_v35, %v6276_v35  ;;  %v264_v24 = vmul.f32 %v6279_v21, %v6279_v21 }
 0x152   :  { %v6321_v31 = vpack.c.bf16 %v829_v30, %v822_v27 }
 0x153   :  { %v6288_v47 = vsub.f32 %v6203_v28, %v233_v42  ;;  %v6291_v25 = vsub.f32 %v6205_v29, %v234_v43  ;;  %v303_v48 = vsel %vm169_vm0, %v263_v46, 0.0  ;;  %v306_v49 = vsel %vm169_vm0, %v264_v24, 0.0  ;;  %v521_v29 = vld [vmem:[#allocation12] sm:$0xff] }
 0x154   :  { %301 = vadd.xlane.f32.xlu1 %v300_v41  ;;  %304 = vadd.xlane.f32.xlu0 %v303_v48  ;;  %v575_v56 = vand.u32 4294901760, %v521_v29 }
 0x155   :  { %v265_v50 = vmul.f32 %v6288_v47, %v6288_v47  ;;  %v266_v51 = vmul.f32 %v6291_v25, %v6291_v25 }
 0x156   :  { %v6301_v58 = vpack.c.bf16 %v578_v57, %v575_v56  ;;  %v805_v2 = vsub.f32 %v521_v29, %v575_v56 }
 0x157   :  { %v309_v52 = vsel %vm169_vm0, %v265_v50, 0.0  ;;  %v312_v28 = vsel %vm169_vm0, %v266_v51, 0.0 }
 0x158   :  { %307 = vadd.xlane.f32.xlu1 %v306_v49  ;;  %310 = vadd.xlane.f32.xlu0 %v309_v52  ;;  %v806_v4 = vand.u32 4294901760, %v805_v2  ;;  %v6323_v32 = vpack.c.bf16 %v812_v3, %v805_v2 }
 0x159   :  { %5286 = vmatprep.subr.bf16.mxu0 %v6301_v58  ;;  %5262 = vmatprep.subr.bf16.mxu1 %v6301_v58 }
 0x15a   :  { %5288 = vmatpush3.bf16.msra.mxu0 %v6301_v58  ;;  %5264 = vmatpush3.bf16.msra.mxu1 %v6301_v58  ;;  %v807_v6 = vsub.f32 %v805_v2, %v806_v4  ;;  %v6313_v8 = vpack.c.bf16 %v813_v5, %v806_v4  ;;  %v6330_v4 = vld [vmem:[#allocation11] ss:$0 sm:$0xff] }
 0x15b   :  { %5290 = vmatprep.subr.bf16.mxu0 %v6307_v63  ;;  %5266 = vmatprep.subr.bf16.mxu1 %v6307_v63 }
 0x15c   :  { %313 = vadd.xlane.f32.xlu1 %v312_v28  ;;  %v808_v9 = vand.u32 4294901760, %v807_v6 }
 0x15e   :  { %5292 = vmatpush3.bf16.msra.mxu0 %v6307_v63  ;;  %5268 = vmatpush3.bf16.msra.mxu1 %v6307_v63  ;;  %v6316_v15 = vpack.c.bf16 %v815_v12, %v808_v9 }
 0x15f   :  { %5294 = vmatprep.subr.bf16.mxu0 %v6313_v8 }
 0x160   :  { %5270 = vmatprep.subr.bf16.mxu1 %v6316_v15 }
 0x1c9   :  { %v269_v34 = vpop.xlane.xlu0 %268 }
 0x1ca   :  { %v315_v20 = vmul.f32 0.03125, %v269_v34 }
 0x1cc   :  { %v331_v38 = vadd.f32 1e-05, %v315_v20 }
 0x1cd   :  { %v272_v39 = vpop.xlane.xlu1 %271  ;;  %v275_v40 = vpop.xlane.xlu0 %274 }
 0x1ce   :  { %5660 = vrsqrt.f32 %v331_v38  ;;  %v316_v41 = vmul.f32 0.03125, %v272_v39  ;;  %v317_v42 = vmul.f32 0.03125, %v275_v40 }
 0x1d0   :  { %v332_v43 = vadd.f32 1e-05, %v316_v41  ;;  %v333_v46 = vadd.f32 1e-05, %v317_v42 }
 0x1d1   :  { %v278_v24 = vpop.xlane.xlu1 %277  ;;  %v281_v48 = vpop.xlane.xlu0 %280 }
 0x1d2   :  { %5662 = vrsqrt.f32 %v332_v43  ;;  %v318_v49 = vmul.f32 0.03125, %v278_v24  ;;  %v319_v50 = vmul.f32 0.03125, %v281_v48 }
 0x1d3   :  { %5664 = vrsqrt.f32 %v333_v46 }
 0x1d4   :  { %v334_v51 = vadd.f32 1e-05, %v318_v49  ;;  %v335_v52 = vadd.f32 1e-05, %v319_v50 }
 0x1d5   :  { %v284_v28 = vpop.xlane.xlu1 %283  ;;  %v287_v29 = vpop.xlane.xlu0 %286 }
 0x1d6   :  { %5666 = vrsqrt.f32 %v334_v51  ;;  %v320_v53 = vmul.f32 0.03125, %v284_v28  ;;  %v321_v56 = vmul.f32 0.03125, %v287_v29 }
 0x1d7   :  { %5668 = vrsqrt.f32 %v335_v52 }
 0x1d8   :  { %v5661_v57 = vpop.eup %5660  ;;  %v336_v60 = vadd.f32 1e-05, %v320_v53  ;;  %v337_v61 = vadd.f32 1e-05, %v321_v56 }
 0x1d9   :  { %v363_v62 = vmul.f32 %v5661_v57, %v6211_v36  ;;  %v290_v2 = vpop.xlane.xlu1 %289  ;;  %v293_v3 = vpop.xlane.xlu0 %292 }
 0x1da   :  { %5670 = vrsqrt.f32 %v336_v60  ;;  %v322_v5 = vmul.f32 0.03125, %v290_v2  ;;  %v323_v6 = vmul.f32 0.03125, %v293_v3 }
 0x1db   :  { %v386_v7 = vmul.f32 %v6327_v59, %v363_v62  ;;  %5672 = vrsqrt.f32 %v337_v61 }
 0x1dc   :  { %v5663_v9 = vpop.eup %5662  ;;  %v338_v12 = vadd.f32 1e-05, %v322_v5  ;;  %v339_v13 = vadd.f32 1e-05, %v323_v6 }
 0x1dd   :  { %v5665_v14 = vpop.eup %5664  ;;  %v409_v18 = vadd.f32 %v6330_v4, %v386_v7  ;;  %v364_v19 = vmul.f32 %v5663_v9, %v6219_v44  ;;  %v296_v22 = vpop.xlane.xlu1 %295 }
 0x1de   :  { %v299_v36 = vpop.xlane.xlu0 %298  ;;  %v365_v16 = vmul.f32 %v5665_v14, %v6213_v37  ;;  %5674 = vrsqrt.f32 %v338_v12  ;;  %v324_v27 = vmul.f32 0.03125, %v296_v22 }
 0x1df   :  { %v325_v30 = vmul.f32 0.03125, %v299_v36  ;;  %425 = vst.msk [vmem:[#allocation2] sm:$0xff] %vm169_vm0, %v409_v18  ;;  %v387_v34 = vmul.f32 %v6327_v59, %v364_v19  ;;  %5676 = vrsqrt.f32 %v339_v13 }
 0x1e0   :  { %v5667_v20 = vpop.eup %5666  ;;  %v388_v38 = vmul.f32 %v6327_v59, %v365_v16  ;;  %v340_v39 = vadd.f32 1e-05, %v324_v27 }
 0x1e1   :  { %v341_v40 = vadd.f32 1e-05, %v325_v30  ;;  %v5669_v41 = vpop.eup %5668  ;;  %v410_v44 = vadd.f32 %v6330_v4, %v387_v34  ;;  %v366_v42 = vmul.f32 %v5667_v20, %v6221_v45  ;;  %v302_v43 = vpop.xlane.xlu1 %301 }
 0x1e2   :  { %v305_v37 = vpop.xlane.xlu0 %304  ;;  %v411_v46 = vadd.f32 %v6330_v4, %v388_v38  ;;  %v367_v24 = vmul.f32 %v5669_v41, %v6229_v54  ;;  %5678 = vrsqrt.f32 %v340_v39  ;;  %v326_v48 = vmul.f32 0.03125, %v302_v43 }
 0x1e3   :  { %426 = vst.msk [vmem:[#allocation2 + $0x8] sm:$0xff] %vm169_vm0, %v410_v44  ;;  %v389_v49 = vmul.f32 %v6327_v59, %v366_v42  ;;  %5680 = vrsqrt.f32 %v341_v40  ;;  %v327_v50 = vmul.f32 0.03125, %v305_v37 }
 0x1e4   :  { %v5671_v51 = vpop.eup %5670  ;;  %427 = vst.msk [vmem:[#allocation2 + $0x10] sm:$0xff] %vm169_vm0, %v411_v46  ;;  %v390_v52 = vmul.f32 %v6327_v59, %v367_v24  ;;  %v342_v45 = vadd.f32 1e-05, %v326_v48 }
 0x1e5   :  { %v5673_v28 = vpop.eup %5672  ;;  %v412_v29 = vadd.f32 %v6330_v4, %v389_v49  ;;  %v368_v53 = vmul.f32 %v5671_v51, %v6231_v55  ;;  %v343_v54 = vadd.f32 1e-05, %v327_v50  ;;  %v308_v56 = vpop.xlane.xlu1 %307 }
 0x1e6   :  { %v311_v57 = vpop.xlane.xlu0 %310  ;;  %v413_v60 = vadd.f32 %v6330_v4, %v390_v52  ;;  %v369_v61 = vmul.f32 %v5673_v28, %v6240_v0  ;;  %5682 = vrsqrt.f32 %v342_v45  ;;  %v328_v62 = vmul.f32 0.03125, %v308_v56  ;;  %v489_v2 = vld [vmem:[#allocation2] sm:$0xff] }
 0x1e7   :  { %428 = vst.msk [vmem:[#allocation2 + $0x18] sm:$0xff] %vm169_vm0, %v412_v29  ;;  %v391_v3 = vmul.f32 %v6327_v59, %v368_v53  ;;  %5684 = vrsqrt.f32 %v343_v54  ;;  %v329_v5 = vmul.f32 0.03125, %v311_v57  ;;  %v527_v6 = vsel %vm169_vm0, %v489_v2, 0 }
 0x1e8   :  { %v5675_v7 = vpop.eup %5674  ;;  %429 = vst.msk [vmem:[#allocation2 + $0x20] sm:$0xff] %vm169_vm0, %v413_v60  ;;  %v392_v55 = vmul.f32 %v6327_v59, %v369_v61  ;;  %v344_v9 = vadd.f32 1e-05, %v328_v62  ;;  %v6356_v12 = vand.u32 4294901760, %v527_v6 }
 0x1e9   :  { %v5677_v0 = vpop.eup %5676  ;;  %v414_v13 = vadd.f32 %v6330_v4, %v391_v3  ;;  %v370_v14 = vmul.f32 %v5675_v7, %v6243_v1  ;;  %v345_v18 = vadd.f32 1e-05, %v329_v5  ;;  %v314_v19 = vpop.xlane.xlu1 %313 }
 0x1ea   :  { %7318 = vst [vmem:[#allocation32_spill] sm:$0xff] %v6356_v12  ;;  %v415_v22 = vadd.f32 %v6330_v4, %v392_v55  ;;  %v371_v36 = vmul.f32 %v5677_v0, %v6252_v10  ;;  %5686 = vrsqrt.f32 %v344_v9  ;;  %v330_v16 = vmul.f32 0.03125, %v314_v19  ;;  %v490_v27 = vld [vmem:[#allocation2 + $0x8] sm:$0xff] }
 0x1eb   :  { %430 = vst.msk [vmem:[#allocation2 + $0x28] sm:$0xff] %vm169_vm0, %v414_v13  ;;  %v393_v30 = vmul.f32 %v6327_v59, %v370_v14  ;;  %5688 = vrsqrt.f32 %v345_v18  ;;  %v6365_v34 = vsub.f32 %v527_v6, %v6356_v12  ;;  %v530_v20 = vsel %vm169_vm0, %v490_v27, 0  ;;  %v491_v1 = vld [vmem:[#allocation2 + $0x10] sm:$0xff] }
 0x1ec   :  { %v5679_v38 = vpop.eup %5678  ;;  %431 = vst.msk [vmem:[#allocation2 + $0x30] sm:$0xff] %vm169_vm0, %v415_v22  ;;  %v394_v39 = vmul.f32 %v6327_v59, %v371_v36  ;;  %v346_v10 = vadd.f32 1e-05, %v330_v16  ;;  %v6370_v40 = vand.u32 4294901760, %v530_v20  ;;  %v533_v41 = vsel %vm169_vm0, %v491_v1, 0 }
 0x1ed   :  { %v5681_v44 = vpop.eup %5680  ;;  %v416_v42 = vadd.f32 %v6330_v4, %v393_v30  ;;  %v372_v43 = vmul.f32 %v5679_v38, %v6255_v11  ;;  %v6376_v37 = vand.u32 4294901760, %v6365_v34  ;;  %v6378_v46 = vand.u32 4294901760, %v533_v41 }
 0x1ee   :  { %v417_v24 = vadd.f32 %v6330_v4, %v394_v39  ;;  %v373_v48 = vmul.f32 %v5681_v44, %v6264_v23  ;;  %5690 = vrsqrt.f32 %v346_v10  ;;  %v6383_v49 = vsub.f32 %v530_v20, %v6370_v40  ;;  %v492_v50 = vld [vmem:[#allocation2 + $0x18] sm:$0xff] }
 0x1ef   :  { %7319 = vst [vmem:[#allocation33_spill] sm:$0xff] %v6376_v37  ;;  %432 = vst.msk [vmem:[#allocation2 + $0x38] sm:$0xff] %vm169_vm0, %v416_v42  ;;  %v395_v51 = vmul.f32 %v6327_v59, %v372_v43  ;;  %4789 = vmatprep.mubr.f32.mxu0 %v6376_v37  ;;  %v646_v11 = vsub.f32 %v6365_v34, %v6376_v37  ;;  %v6391_v52 = vsub.f32 %v533_v41, %v6378_v46  ;;  %v493_v23 = vld [vmem:[#allocation2 + $0x20] sm:$0xff] }
 0x1f0   :  { %v536_v45 = vsel %vm169_vm0, %v492_v50, 0  ;;  %v5683_v28 = vpop.eup %5682  ;;  %433 = vst.msk [vmem:[#allocation2 + $0x40] sm:$0xff] %vm169_vm0, %v417_v24  ;;  %v396_v29 = vmul.f32 %v6327_v59, %v373_v48  ;;  %v6397_v53 = vand.u32 4294901760, %v6383_v49  ;;  %v539_v56 = vsel %vm169_vm0, %v493_v23, 0  ;;  %v2937_v37 = vld [vmem:[#allocation15 + $0x18] sm:$0xff] }
 0x1f1   :  { %v6399_v54 = vand.u32 4294901760, %v536_v45  ;;  %v5685_v57 = vpop.eup %5684  ;;  %v418_v60 = vadd.f32 %v6330_v4, %v395_v51  ;;  %v374_v61 = vmul.f32 %v5683_v28, %v6267_v17  ;;  %v6404_v62 = vand.u32 4294901760, %v646_v11 }
 0x1f2   :  { %7320 = vst [vmem:[#allocation34_spill] sm:$0xff] %v6397_v53  ;;  %v6407_v2 = vand.u32 4294901760, %v6391_v52  ;;  %v419_v3 = vadd.f32 %v6330_v4, %v396_v29  ;;  %v375_v5 = vmul.f32 %v5685_v57, %v6276_v35  ;;  %4790 = vmatmul.mubr.f32.vlgmr.msra.gmra.mrb[0].mxu0 %v6397_v53  ;;  %v656_v6 = vsub.f32 %v6383_v49, %v6397_v53  ;;  %v494_v55 = vld [vmem:[#allocation2 + $0x28] sm:$0xff]  ;;  %v2936_v53 = vld [vmem:[#allocation15 + $0x10] sm:$0xff] }
 0x1f3   :  { %v6415_v7 = vsub.f32 %v536_v45, %v6399_v54  ;;  %434 = vst.msk [vmem:[#allocation2 + $0x48] sm:$0xff] %vm169_vm0, %v418_v60  ;;  %v397_v17 = vmul.f32 %v6327_v59, %v374_v61  ;;  %4693 = vmatprep.mubr.f32.mxu1 %v6404_v62  ;;  %v6423_v9 = vand.u32 4294901760, %v539_v56  ;;  %v542_v0 = vsel %vm169_vm0, %v494_v55, 0  ;;  %v495_v13 = vld [vmem:[#allocation2 + $0x30] sm:$0xff]  ;;  %5296 = vmatpush3.bf16.msra.mxu0 %v6313_v8 }
 0x1f4   :  { %7321 = vst [vmem:[#allocation35_spill] sm:$0xff] %v6407_v2  ;;  %4792 = vmatprep.mubr.f32.mxu0 %v6407_v2  ;;  %v666_v35 = vsub.f32 %v6391_v52, %v6407_v2  ;;  %v5687_v14 = vpop.eup %5686  ;;  %435 = vst.msk [vmem:[#allocation2 + $0x50] sm:$0xff] %vm169_vm0, %v419_v3  ;;  %v398_v18 = vmul.f32 %v6327_v59, %v375_v5  ;;  %v6428_v19 = vand.u32 4294901760, %v656_v6  ;;  %v6434_v36 = vand.u32 4294901760, %v542_v0 }
 0x1f5   :  { %v6431_v22 = vand.u32 4294901760, %v6415_v7  ;;  %v5689_v16 = vpop.eup %5688  ;;  %v420_v27 = vadd.f32 %v6330_v4, %v397_v17  ;;  %v376_v30 = vmul.f32 %v5687_v14, %v6279_v21  ;;  %v6441_v1 = vsub.f32 %v539_v56, %v6423_v9  ;;  %5298 = vmatprep.subr.bf16.mxu0 %v6319_v26 }
 0x1f6   :  { %v6438_v20 = vand.u32 4294901760, %v666_v35  ;;  %v421_v38 = vadd.f32 %v6330_v4, %v398_v18  ;;  %v377_v39 = vmul.f32 %v5689_v16, %v6288_v47  ;;  %4694 = vmatmul.mubr.f32.vlgmr.msra.gmra.mrb[0].mxu1 %v6428_v19  ;;  %v545_v21 = vsel %vm169_vm0, %v495_v13, 0  ;;  %v496_v10 = vld [vmem:[#allocation2 + $0x38] sm:$0xff] }
 0x1f7   :  { %7322 = vst [vmem:[#allocation36_spill] sm:$0xff] %v6431_v22  ;;  %4793 = vmatmul.mubr.f32.gmra.mrb[2].mxu0 %v6431_v22  ;;  %v676_v8 = vsub.f32 %v6415_v7, %v6431_v22  ;;  %436 = vst.msk [vmem:[#allocation2 + $0x58] sm:$0xff] %vm169_vm0, %v420_v27  ;;  %v399_v41 = vmul.f32 %v6327_v59, %v376_v30  ;;  %5272 = vmatpush3.bf16.msra.mxu1 %v6316_v15  ;;  %v6456_v47 = vand.u32 4294901760, %v6441_v1  ;;  %v497_v43 = vld [vmem:[#allocation2 + $0x40] sm:$0xff] }
 0x1f8   :  { %4696 = vmatprep.mubr.f32.mxu1 %v6438_v20  ;;  %v6459_v44 = vsub.f32 %v542_v0, %v6434_v36  ;;  %v6461_v42 = vand.u32 4294901760, %v545_v21  ;;  %v5691_v24 = vpop.eup %5690  ;;  %437 = vst.msk [vmem:[#allocation2 + $0x60] sm:$0xff] %vm169_vm0, %v421_v38  ;;  %v400_v48 = vmul.f32 %v6327_v59, %v377_v39  ;;  %v548_v15 = vsel %vm169_vm0, %v496_v10, 0  ;;  %5274 = vmatprep.subr.bf16.mxu1 %v6321_v31 }
 0x1f9   :  { %7323 = vst [vmem:[#allocation37_spill] sm:$0xff] %v6456_v47  ;;  %v6465_v50 = vand.u32 4294901760, %v676_v8  ;;  %v551_v51 = vsel %vm169_vm0, %v497_v43, 0  ;;  %5300 = vmatpush3.bf16.msra.mxu0 %v6319_v26  ;;  %v422_v11 = vadd.f32 %v6330_v4, %v399_v41  ;;  %v378_v45 = vmul.f32 %v5691_v24, %v6291_v25  ;;  %4795 = vmatprep.mubr.f32.mxu0 %v6456_v47 }
 0x1fa   :  { %v6475_v23 = vand.u32 4294901760, %v6459_v44  ;;  %v686_v28 = vsub.f32 %v6441_v1, %v6456_v47  ;;  %5302 = vmatprep.subr.bf16.mxu0 %v6301_v58  ;;  %v423_v29 = vadd.f32 %v6330_v4, %v400_v48  ;;  %v6483_v26 = vsub.f32 %v545_v21, %v6461_v42  ;;  %v498_v57 = vld [vmem:[#allocation2 + $0x48] sm:$0xff] }
 0x1fb   :  { %4697 = vmatmul.mubr.f32.gmra.mrb[2].mxu1 %v6465_v50  ;;  %v6485_v56 = vand.u32 4294901760, %v548_v15  ;;  %v6487_v25 = vand.u32 4294901760, %v551_v51  ;;  %438 = vst.msk [vmem:[#allocation2 + $0x68] sm:$0xff] %vm169_vm0, %v422_v11  ;;  %v401_v60 = vmul.f32 %v6327_v59, %v378_v45  ;;  %v554_v5 = vsel %vm169_vm0, %v498_v57, 0  ;;  %v499_v6 = vld [vmem:[#allocation2 + $0x50] sm:$0xff] }
 0x1fc   :  { %7324 = vst [vmem:[#allocation38_spill] sm:$0xff] %v6475_v23  ;;  %4796 = vmatmul.mubr.f32.gmra.mrb[4].mxu0 %v6475_v23  ;;  %v6492_v61 = vand.u32 4294901760, %v686_v28  ;;  %v696_v3 = vsub.f32 %v6459_v44, %v6475_v23  ;;  %5276 = vmatpush3.bf16.msra.mxu1 %v6321_v31  ;;  %439 = vst.msk [vmem:[#allocation2 + $0x70] sm:$0xff] %vm169_vm0, %v423_v29  ;;  %v6500_v55 = vand.u32 4294901760, %v6483_v26  ;;  %v6508_v35 = vand.u32 4294901760, %v554_v5 }
 0x1fd   :  { %v6503_v17 = vsub.f32 %v548_v15, %v6485_v56  ;;  %v6506_v59 = vsub.f32 %v551_v51, %v6487_v25  ;;  %5278 = vmatprep.subr.bf16.mxu1 %v6323_v32  ;;  %v424_v0 = vadd.f32 %v6330_v4, %v401_v60  ;;  %v557_v13 = vsel %vm169_vm0, %v499_v6, 0 }
 0x1fe   :  { %7325 = vst [vmem:[#allocation39_spill] sm:$0xff] %v6500_v55  ;;  %4699 = vmatprep.mubr.f32.mxu1 %v6492_v61  ;;  %v6513_v31 = vand.u32 4294901760, %v696_v3  ;;  %4798 = vmatprep.mubr.f32.mxu0 %v6500_v55  ;;  %v706_v18 = vsub.f32 %v6483_v26, %v6500_v55  ;;  %v6526_v27 = vsub.f32 %v554_v5, %v6508_v35  ;;  %v500_v4 = vld [vmem:[#allocation2 + $0x58] sm:$0xff]  ;;  %v6530_v30 = vand.u32 4294901760, %v557_v13 }
 0x1ff   :  { %v6518_v14 = vand.u32 4294901760, %v6503_v17  ;;  %v6523_v16 = vand.u32 4294901760, %v6506_v59  ;;  %440 = vst.msk [vmem:[#allocation2 + $0x78] sm:$0xff] %vm169_vm0, %v424_v0  ;;  %v560_v38 = vsel %vm169_vm0, %v500_v4, 0  ;;  %v501_v39 = vld [vmem:[#allocation2 + $0x60] sm:$0xff] }
 0x200   :  { %4700 = vmatmul.mubr.f32.gmra.mrb[4].mxu1 %v6513_v31  ;;  %v6534_v8 = vand.u32 4294901760, %v706_v18  ;;  %v6539_v10 = vand.u32 4294901760, %v6526_v27  ;;  %v6545_v43 = vsub.f32 %v557_v13, %v6530_v30  ;;  %v6547_v24 = vand.u32 4294901760, %v560_v38 }
 0x201   :  { %7326 = vst [vmem:[#allocation40_spill] sm:$0xff] %v6518_v14  ;;  %7327 = vst [vmem:[#allocation41_spill] sm:$0xff] %v6523_v16  ;;  %4799 = vmatmul.mubr.f32.gmra.mrb[6].mxu0 %v6518_v14  ;;  %v716_v21 = vsub.f32 %v6503_v17, %v6518_v14  ;;  %v726_v41 = vsub.f32 %v6506_v59, %v6523_v16  ;;  %v563_v48 = vsel %vm169_vm0, %v501_v39, 0 }
 0x202   :  { %7328 = vst [vmem:[#allocation42_spill] sm:$0xff] %v6539_v10  ;;  %4801 = vmatprep.mubr.f32.mxu0 %v6523_v16  ;;  %4702 = vmatprep.mubr.f32.mxu1 %v6534_v8  ;;  %v736_v11 = vsub.f32 %v6526_v27, %v6539_v10  ;;  %v6557_v45 = vand.u32 4294901760, %v563_v48  ;;  %v502_v28 = vld [vmem:[#allocation2 + $0x68] sm:$0xff]  ;;  %v6560_v29 = vand.u32 4294901760, %v6545_v43  ;;  %v6563_v57 = vsub.f32 %v560_v38, %v6547_v24 }
 0x203   :  { %v6551_v15 = vand.u32 4294901760, %v716_v21  ;;  %v6553_v51 = vand.u32 4294901760, %v726_v41  ;;  %v566_v60 = vsel %vm169_vm0, %v502_v28, 0  ;;  %v503_v3 = vld [vmem:[#allocation2 + $0x70] sm:$0xff] }
 0x204   :  { %7330 = vst [vmem:[#allocation44_spill] sm:$0xff] %v6560_v29  ;;  %v6568_v5 = vand.u32 4294901760, %v736_v11  ;;  %v6571_v6 = vsub.f32 %v563_v48, %v6557_v45  ;;  %v6573_v0 = vand.u32 4294901760, %v566_v60  ;;  %v569_v13 = vsel %vm169_vm0, %v503_v3, 0 }
 0x205   :  { %7329 = vst [vmem:[#allocation43_spill] sm:$0xff] %v6553_v51  ;;  %4703 = vmatmul.mubr.f32.gmra.mrb[6].mxu1 %v6551_v15  ;;  %4802 = vmatmul.mubr.f32.gmra.mrb[8].mxu0 %v6539_v10  ;;  %v6579_v18 = vand.u32 4294901760, %v6563_v57  ;;  %v746_v4 = vsub.f32 %v6545_v43, %v6560_v29  ;;  %v6583_v38 = vand.u32 4294901760, %v569_v13 }
 0x206   :  { %7331 = vst [vmem:[#allocation45_spill] sm:$0xff] %v6568_v5  ;;  %4705 = vmatprep.mubr.f32.mxu1 %v6553_v51  ;;  %4804 = vmatprep.mubr.f32.mxu0 %v6560_v29  ;;  %v6586_v39 = vand.u32 4294901760, %v6571_v6  ;;  %v6589_v21 = vsub.f32 %v566_v60, %v6573_v0  ;;  %v504_v41 = vld [vmem:[#allocation2 + $0x78] sm:$0xff] }
 0x207   :  { %7332 = vst [vmem:[#allocation46_spill] sm:$0xff] %v6579_v18  ;;  %v6591_v48 = vand.u32 4294901760, %v746_v4  ;;  %v756_v11 = vsub.f32 %v6563_v57, %v6579_v18  ;;  %v6596_v28 = vsub.f32 %v569_v13, %v6583_v38  ;;  %v572_v3 = vsel %vm169_vm0, %v504_v41, 0 }
 0x208   :  { %7333 = vst [vmem:[#allocation47_spill] sm:$0xff] %v6586_v39  ;;  %v6602_v29 = vand.u32 4294901760, %v6589_v21  ;;  %v766_v60 = vsub.f32 %v6571_v6, %v6586_v39  ;;  %v6606_v4 = vand.u32 4294901760, %v572_v3 }
 0x209   :  { %7334 = vst [vmem:[#allocation48_spill] sm:$0xff] %v6591_v48  ;;  %4706 = vmatmul.mubr.f32.gmra.mrb[8].mxu1 %v6568_v5  ;;  %4805 = vmatmul.mubr.f32.gmra.mrb[10].mxu0 %v6579_v18  ;;  %v6610_v13 = vand.u32 4294901760, %v756_v11  ;;  %v6613_v41 = vand.u32 4294901760, %v6596_v28 }
 0x20a   :  { %7335 = vst [vmem:[#allocation49_spill] sm:$0xff] %v6602_v29  ;;  %4708 = vmatprep.mubr.f32.mxu1 %v6591_v48  ;;  %4807 = vmatprep.mubr.f32.mxu0 %v6586_v39  ;;  %v6615_v10 = vand.u32 4294901760, %v766_v60  ;;  %v776_v18 = vsub.f32 %v6589_v21, %v6602_v29  ;;  %v6620_v16 = vsub.f32 %v572_v3, %v6606_v4 }
 0x20b   :  { %7336 = vst [vmem:[#allocation50_spill] sm:$0xff] %v6610_v13  ;;  %7337 = vst [vmem:[#allocation51_spill] sm:$0xff] %v6613_v41  ;;  %v786_v14 = vsub.f32 %v6596_v28, %v6613_v41 }
 0x20c   :  { %7338 = vst [vmem:[#allocation52_spill] sm:$0xff] %v6615_v10  ;;  %v6626_v11 = vand.u32 4294901760, %v776_v18  ;;  %v6629_v39 = vand.u32 4294901760, %v6620_v16  ;;  %v2934_v18 = vld [vmem:[#allocation15] sm:$0xff] }
 0x20d   :  { %4709 = vmatmul.mubr.f32.gmra.mrb[10].mxu1 %v6610_v13  ;;  %4808 = vmatmul.mubr.f32.gmra.mrb[12].mxu0 %v6602_v29  ;;  %v6633_v60 = vand.u32 4294901760, %v786_v14  ;;  %v2935_v29 = vld [vmem:[#allocation15 + $0x8] sm:$0xff]  ;;  %v1752_v14 = vld [vmem:[#allocation14] sm:$0xff] }
 0x20e   :  { %7339 = vst [vmem:[#allocation53_spill] sm:$0xff] %v6626_v11  ;;  %7340 = vst [vmem:[#allocation54_spill] sm:$0xff] %v6629_v39  ;;  %4711 = vmatprep.mubr.f32.mxu1 %v6615_v10  ;;  %4810 = vmatprep.mubr.f32.mxu0 %v6613_v41  ;;  %v796_v3 = vsub.f32 %v6620_v16, %v6629_v39  ;;  %v1753_v41 = vld [vmem:[#allocation14 + $0x8] sm:$0xff]  ;;  %v1757_v23 = vand.u32 4294901760, %v1752_v14 }
 0x20f   :  { %7341 = vst [vmem:[#allocation55_spill] sm:$0xff] %v6633_v60  ;;  %v1760_v47 = vand.u32 4294901760, %v1753_v41 }
 0x210   :  { %v6639_v55 = vand.u32 4294901760, %v796_v3  ;;  %v2939_v3 = vand.u32 4294901760, %v2934_v18 }
 0x211   :  { %4712 = vmatmul.mubr.f32.gmra.mrb[12].mxu1 %v6626_v11  ;;  %4811 = vmatmul.mubr.f32.gmra.mrb[14].mxu0 %v6629_v39  ;;  %v2942_v39 = vand.u32 4294901760, %v2935_v29  ;;  %v6685_v2 = vsub.f32 %v1753_v41, %v1760_v47 }
 0x212   :  { %7342 = vst [vmem:[#allocation56_spill] sm:$0xff] %v6639_v55  ;;  %4714 = vmatprep.mubr.f32.mxu1 %v6633_v60  ;;  %4821 = vmatprep.mubr.f32.mxu0 %v6356_v12 }
 0x213   :  { %v6655_v22 = vpack.c.bf16 %v2942_v39, %v2939_v3  ;;  %v7346_v48 = vand.u32 4294901760, %v6685_v2 }
 0x215   :  { %4715 = vmatmul.mubr.f32.gmra.mrb[14].mxu1 %v6639_v55  ;;  %4822 = vmatmul.mubr.f32.vlgmr.msra.gmra.mrb[0].mxu0 %v6370_v40 }
 0x216   :  { %4725 = vmatprep.mubr.f32.mxu1 %v6356_v12  ;;  %4824 = vmatprep.mubr.f32.mxu0 %v6378_v46 }
 0x217   :  { %5304 = vmatpush3.bf16.msra.mxu0 %v6301_v58  ;;  %v6658_v58 = vpack.c.bf16 %v1760_v47, %v1757_v23 }
 0x218   :  { %5306 = vmatprep.subr.bf16.mxu0 %v6307_v63 }
 0x219   :  { %4726 = vmatmul.mubr.f32.vlgmr.msra.gmra.mrb[0].mxu1 %v6370_v40  ;;  %4825 = vmatmul.mubr.f32.gmra.mrb[2].mxu0 %v6399_v54 }
 0x21a   :  { %5280 = vmatpush3.bf16.msra.mxu1 %v6323_v32  ;;  %4728 = vmatprep.mubr.f32.mxu1 %v6378_v46  ;;  %v6681_v32 = vsub.f32 %v2935_v29, %v2942_v39  ;;  %v1754_v29 = vld [vmem:[#allocation14 + $0x10] sm:$0xff]  ;;  %v1755_v39 = vld [vmem:[#allocation14 + $0x18] sm:$0xff] }
 0x21b   :  { %4827 = vmatprep.mubr.f32.mxu0 %v6423_v9  ;;  %5282 = vmatprep.subr.bf16.mxu1 %v6325_v33  ;;  %v1766_v55 = vand.u32 4294901760, %v1755_v39 }
 0x21c   :  { %5308 = vmatpush3.bf16.msra.mxu0 %v6307_v63  ;;  %v6679_v63 = vsub.f32 %v2934_v18, %v2939_v3  ;;  %v1763_v3 = vand.u32 4294901760, %v1754_v29  ;;  %v7344_v11 = vand.u32 4294901760, %v6681_v32 }
 0x21d   :  { %4729 = vmatmul.mubr.f32.gmra.mrb[2].mxu1 %v6399_v54  ;;  %4828 = vmatmul.mubr.f32.gmra.mrb[4].mxu0 %v6434_v36 }
 0x21e   :  { %4731 = vmatprep.mubr.f32.mxu1 %v6423_v9  ;;  %4830 = vmatprep.mubr.f32.mxu0 %v6461_v42  ;;  %v7343_v18 = vand.u32 4294901760, %v6679_v63  ;;  %v3178_v47 = vsub.f32 %v6681_v32, %v7344_v11  ;;  %v6718_v11 = vpack.c.bf16 %v1766_v55, %v1763_v3 }
 0x21f   :  { %5284 = vmatpush3.bf16.msra.mxu1 %v6325_v33  ;;  %5358 = vmatprep.subr.bf16.mxu0 %v6655_v22  ;;  %v6683_v33 = vsub.f32 %v1752_v14, %v1757_v23  ;;  %v2945_v23 = vand.u32 4294901760, %v2936_v53  ;;  %v2948_v14 = vand.u32 4294901760, %v2937_v37 }
 0x220   :  { %5310 = vmatprep.subr.bf16.mxu1 %v6658_v58  ;;  %v3171_v60 = vsub.f32 %v6679_v63, %v7343_v18  ;;  %v3179_v5 = vand.u32 4294901760, %v3178_v47 }
 0x221   :  { %4732 = vmatmul.mubr.f32.gmra.mrb[4].mxu1 %v6434_v36  ;;  %4831 = vmatmul.mubr.f32.gmra.mrb[6].mxu0 %v6485_v56  ;;  %v6705_v10 = vpack.c.bf16 %v2948_v14, %v2945_v23  ;;  %v7345_v41 = vand.u32 4294901760, %v6683_v33 }
 0x222   :  { %4734 = vmatprep.mubr.f32.mxu1 %v6461_v42  ;;  %4833 = vmatprep.mubr.f32.mxu0 %v6487_v25  ;;  %v3172_v18 = vand.u32 4294901760, %v3171_v60 }
 0x223   :  { %v1989_v13 = vsub.f32 %v6683_v33, %v7345_v41 }
 0x225   :  { %4735 = vmatmul.mubr.f32.gmra.mrb[6].mxu1 %v6485_v56  ;;  %4834 = vmatmul.mubr.f32.gmra.mrb[8].mxu0 %v6508_v35  ;;  %v1990_v41 = vand.u32 4294901760, %v1989_v13  ;;  %v6747_v13 = vsub.f32 %v1755_v39, %v1766_v55 }
 0x226   :  { %4737 = vmatprep.mubr.f32.mxu1 %v6487_v25  ;;  %4836 = vmatprep.mubr.f32.mxu0 %v6530_v30 }
 0x229   :  { %4738 = vmatmul.mubr.f32.gmra.mrb[8].mxu1 %v6508_v35  ;;  %4837 = vmatmul.mubr.f32.gmra.mrb[10].mxu0 %v6547_v24 }
 0x22a   :  { %4740 = vmatprep.mubr.f32.mxu1 %v6530_v30  ;;  %4839 = vmatprep.mubr.f32.mxu0 %v6557_v45 }
 0x22d   :  { %4741 = vmatmul.mubr.f32.gmra.mrb[10].mxu1 %v6547_v24  ;;  %4840 = vmatmul.mubr.f32.gmra.mrb[12].mxu0 %v6573_v0 }
 0x22e   :  { %4743 = vmatprep.mubr.f32.mxu1 %v6557_v45  ;;  %4842 = vmatprep.mubr.f32.mxu0 %v6583_v38 }
 0x231   :  { %4744 = vmatmul.mubr.f32.gmra.mrb[12].mxu1 %v6573_v0  ;;  %4843 = vmatmul.mubr.f32.gmra.mrb[14].mxu0 %v6606_v4 }
 0x232   :  { %4746 = vmatprep.mubr.f32.mxu1 %v6583_v38  ;;  %4853 = vmatprep.mubr.f32.mxu0 %v6356_v12  ;;  %v1996_v12 = vsub.f32 %v6685_v2, %v7346_v48  ;;  %v5365_v48 = vpack.c.bf16 %v3179_v5, %v3172_v18  ;;  %v6745_v5 = vsub.f32 %v1754_v29, %v1763_v3  ;;  %v2009_v29 = vand.u32 4294901760, %v6747_v13 }
 0x234   :  { %v1997_v51 = vand.u32 4294901760, %v1996_v12  ;;  %v6737_v12 = vsub.f32 %v2936_v53, %v2945_v23  ;;  %v2002_v53 = vand.u32 4294901760, %v6745_v5 }
 0x235   :  { %4747 = vmatmul.mubr.f32.gmra.mrb[14].mxu1 %v6606_v4  ;;  %4854 = vmatmul.mubr.f32.vlgmr.msra.gmra.mrb[0].mxu0 %v6370_v40 }
 0x236   :  { %4757 = vmatprep.mubr.f32.mxu1 %v6365_v34  ;;  %4856 = vmatprep.mubr.f32.mxu0 %v6378_v46  ;;  %v5317_v60 = vpack.c.bf16 %v1997_v51, %v1990_v41  ;;  %v6739_v51 = vsub.f32 %v2937_v37, %v2948_v14  ;;  %v3184_v47 = vand.u32 4294901760, %v6737_v12  ;;  %v2003_v23 = vsub.f32 %v6745_v5, %v2002_v53 }
 0x237   :  { %5360 = vmatpush3.bf16.msra.mxu0 %v6655_v22  ;;  %v2010_v14 = vsub.f32 %v6747_v13, %v2009_v29 }
 0x238   :  { %5362 = vmatprep.subr.bf16.mxu0 %v6705_v10  ;;  %v3191_v18 = vand.u32 4294901760, %v6739_v51  ;;  %v3185_v55 = vsub.f32 %v6737_v12, %v3184_v47 }
 0x239   :  { %4758 = vmatmul.mubr.f32.vlgmr.msra.gmra.mrb[0].mxu1 %v6383_v49  ;;  %4857 = vmatmul.mubr.f32.gmra.mrb[2].mxu0 %v6399_v54 }
 0x23a   :  { %5312 = vmatpush3.bf16.msra.mxu1 %v6658_v58  ;;  %4760 = vmatprep.mubr.f32.mxu1 %v6391_v52  ;;  %v6753_v37 = vpack.c.bf16 %v3191_v18, %v3184_v47  ;;  %v3192_v39 = vsub.f32 %v6739_v51, %v3191_v18  ;;  %v3186_v3 = vand.u32 4294901760, %v3185_v55  ;;  %v2004_v47 = vand.u32 4294901760, %v2003_v23 }
 0x23b   :  { %4859 = vmatprep.mubr.f32.mxu0 %v6423_v9  ;;  %5314 = vmatprep.subr.bf16.mxu1 %v6718_v11  ;;  %v2011_v18 = vand.u32 4294901760, %v2010_v14  ;;  %v5329_v23 = vpack.c.bf16 %v6747_v13, %v6745_v5 }
 0x23c   :  { %5364 = vmatpush3.bf16.msra.mxu0 %v6705_v10  ;;  %7347 = vst [vmem:[#allocation57_spill] sm:$0xff] %v6753_v37  ;;  %v3193_v41 = vand.u32 4294901760, %v3192_v39  ;;  %v5373_v39 = vpack.c.bf16 %v6681_v32, %v6679_v63 }
 0x23d   :  { %4761 = vmatmul.mubr.f32.gmra.mrb[2].mxu1 %v6415_v7  ;;  %4860 = vmatmul.mubr.f32.gmra.mrb[4].mxu0 %v6434_v36  ;;  %v5321_v55 = vpack.c.bf16 %v2011_v18, %v2004_v47 }
 0x23e   :  { %4763 = vmatprep.mubr.f32.mxu1 %v6441_v1  ;;  %4862 = vmatprep.mubr.f32.mxu0 %v6461_v42  ;;  %v5369_v37 = vpack.c.bf16 %v3193_v41, %v3186_v3  ;;  %v7359_v3 = vand.u32 4294901760, %v6683_v33 }
 0x23f   :  { %5316 = vmatpush3.bf16.msra.mxu1 %v6718_v11  ;;  %5366 = vmatprep.subr.bf16.mxu0 %v5365_v48 }
 0x240   :  { %5318 = vmatprep.subr.bf16.mxu1 %v5317_v60 }
 0x241   :  { %4764 = vmatmul.mubr.f32.gmra.mrb[4].mxu1 %v6459_v44  ;;  %4863 = vmatmul.mubr.f32.gmra.mrb[6].mxu0 %v6485_v56 }
 0x242   :  { %4766 = vmatprep.mubr.f32.mxu1 %v6483_v26  ;;  %4865 = vmatprep.mubr.f32.mxu0 %v6487_v25 }
 0x245   :  { %4767 = vmatmul.mubr.f32.gmra.mrb[6].mxu1 %v6503_v17  ;;  %4866 = vmatmul.mubr.f32.gmra.mrb[8].mxu0 %v6508_v35 }
 0x246   :  { %4769 = vmatprep.mubr.f32.mxu1 %v6506_v59  ;;  %4868 = vmatprep.mubr.f32.mxu0 %v6530_v30 }
 0x249   :  { %4770 = vmatmul.mubr.f32.gmra.mrb[8].mxu1 %v6526_v27  ;;  %4869 = vmatmul.mubr.f32.gmra.mrb[10].mxu0 %v6547_v24 }
 0x24a   :  { %4772 = vmatprep.mubr.f32.mxu1 %v6545_v43  ;;  %4871 = vmatprep.mubr.f32.mxu0 %v6557_v45 }
 0x24d   :  { %4773 = vmatmul.mubr.f32.gmra.mrb[10].mxu1 %v6563_v57  ;;  %4872 = vmatmul.mubr.f32.gmra.mrb[12].mxu0 %v6573_v0 }
 0x24e   :  { %4775 = vmatprep.mubr.f32.mxu1 %v6571_v6  ;;  %4874 = vmatprep.mubr.f32.mxu0 %v6583_v38 }
 0x251   :  { %4776 = vmatmul.mubr.f32.gmra.mrb[12].mxu1 %v6589_v21  ;;  %4875 = vmatmul.mubr.f32.gmra.mrb[14].mxu0 %v6606_v4 }
 0x252   :  { %4778 = vmatprep.mubr.f32.mxu1 %v6596_v28  ;;  %5077 = vmatprep.mubr.f32.mxu0 %v6404_v62 }
 0x255   :  { %4779 = vmatmul.mubr.f32.gmra.mrb[14].mxu1 %v6620_v16  ;;  %5078 = vmatmul.mubr.f32.vlgmr.msra.gmra.mrb[16].mxu0 %v6428_v19 }
 0x256   :  { %4885 = vmatprep.mubr.f32.mxu1 %v6404_v62  ;;  %5080 = vmatprep.mubr.f32.mxu0 %v6438_v20  ;;  %v5325_v62 = vpack.c.bf16 %v6685_v2, %v6683_v33  ;;  %v7377_v33 = vld [vmem:[#allocation54_spill] sm:$0xff] }
 0x257   :  { %5368 = vmatpush3.bf16.msra.mxu0 %v5365_v48  ;;  %v7355_v48 = vld [vmem:[#allocation56_spill] sm:$0xff] }
 0x258   :  { %5370 = vmatprep.subr.bf16.mxu0 %v5369_v37 }
 0x259   :  { %4886 = vmatmul.mubr.f32.vlgmr.msra.gmra.mrb[16].mxu1 %v6428_v19  ;;  %5081 = vmatmul.mubr.f32.gmra.mrb[18].mxu0 %v6465_v50  ;;  %v7348_v19 = vld [vmem:[#allocation43_spill] sm:$0xff] }
 0x25a   :  { %5320 = vmatpush3.bf16.msra.mxu1 %v5317_v60  ;;  %4888 = vmatprep.mubr.f32.mxu1 %v6438_v20  ;;  %v7349_v20 = vld [vmem:[#allocation45_spill] sm:$0xff]  ;;  %v7356_v60 = vld [vmem:[#allocation32_spill] sm:$0xff] }
 0x25b   :  { %5083 = vmatprep.mubr.f32.mxu0 %v6492_v61  ;;  %5322 = vmatprep.subr.bf16.mxu1 %v5321_v55 }
 0x25c   :  { %5372 = vmatpush3.bf16.msra.mxu0 %v5369_v37  ;;  %v5377_v37 = vpack.c.bf16 %v6739_v51, %v6737_v12  ;;  %v5981_v12 = vmov 0.0   ;;  %v7358_v51 = vand.u32 4294901760, %v6681_v32  ;;  %v7376_v32 = vld [vmem:[#allocation51_spill] sm:$0xff] }
 0x25d   :  { %4889 = vmatmul.mubr.f32.gmra.mrb[18].mxu1 %v6465_v50  ;;  %5084 = vmatmul.mubr.f32.gmra.mrb[20].mxu0 %v6513_v31  ;;  %v7350_v50 = vld [vmem:[#allocation48_spill] sm:$0xff]  ;;  %442 = vst.msk [vmem:[#allocation3 + $0x8] sm:$0xff] %vm169_vm0, %v5981_v12  ;;  %441 = vst.msk [vmem:[#allocation3] sm:$0xff] %vm169_vm0, %v5981_v12 }
 0x25e   :  { %4891 = vmatprep.mubr.f32.mxu1 %v6492_v61  ;;  %5086 = vmatprep.mubr.f32.mxu0 %v6534_v8  ;;  %v7351_v61 = vld [vmem:[#allocation50_spill] sm:$0xff]  ;;  %443 = vst.msk [vmem:[#allocation3 + $0x10] sm:$0xff] %vm169_vm0, %v5981_v12  ;;  %444 = vst.msk [vmem:[#allocation3 + $0x18] sm:$0xff] %vm169_vm0, %v5981_v12 }
 0x25f   :  { %5324 = vmatpush3.bf16.msra.mxu1 %v5321_v55  ;;  %5374 = vmatprep.subr.bf16.mxu0 %v5373_v39  ;;  %445 = vst.msk [vmem:[#allocation3 + $0x20] sm:$0xff] %vm169_vm0, %v5981_v12  ;;  %446 = vst.msk [vmem:[#allocation3 + $0x28] sm:$0xff] %vm169_vm0, %v5981_v12 }
 0x260   :  { %5326 = vmatprep.subr.bf16.mxu1 %v5325_v62  ;;  %447 = vst.msk [vmem:[#allocation3 + $0x30] sm:$0xff] %vm169_vm0, %v5981_v12  ;;  %448 = vst.msk [vmem:[#allocation3 + $0x38] sm:$0xff] %vm169_vm0, %v5981_v12 }
 0x261   :  { %4892 = vmatmul.mubr.f32.gmra.mrb[20].mxu1 %v6513_v31  ;;  %5087 = vmatmul.mubr.f32.gmra.mrb[22].mxu0 %v6551_v15  ;;  %v7352_v31 = vld [vmem:[#allocation52_spill] sm:$0xff]  ;;  %449 = vst.msk [vmem:[#allocation3 + $0x40] sm:$0xff] %vm169_vm0, %v5981_v12  ;;  %450 = vst.msk [vmem:[#allocation3 + $0x48] sm:$0xff] %vm169_vm0, %v5981_v12 }
 0x262   :  { %4894 = vmatprep.mubr.f32.mxu1 %v6534_v8  ;;  %5089 = vmatprep.mubr.f32.mxu0 %v7348_v19  ;;  %v7353_v8 = vld [vmem:[#allocation53_spill] sm:$0xff]  ;;  %451 = vst.msk [vmem:[#allocation3 + $0x50] sm:$0xff] %vm169_vm0, %v5981_v12  ;;  %452 = vst.msk [vmem:[#allocation3 + $0x58] sm:$0xff] %vm169_vm0, %v5981_v12 }
 0x263   :  { %453 = vst.msk [vmem:[#allocation3 + $0x60] sm:$0xff] %vm169_vm0, %v5981_v12  ;;  %454 = vst.msk [vmem:[#allocation3 + $0x68] sm:$0xff] %vm169_vm0, %v5981_v12 }
 0x264   :  { %455 = vst.msk [vmem:[#allocation3 + $0x70] sm:$0xff] %vm169_vm0, %v5981_v12  ;;  %456 = vst.msk [vmem:[#allocation3 + $0x78] sm:$0xff] %vm169_vm0, %v5981_v12 }
 0x265   :  { %4895 = vmatmul.mubr.f32.gmra.mrb[22].mxu1 %v6551_v15  ;;  %5090 = vmatmul.mubr.f32.gmra.mrb[24].mxu0 %v7349_v20  ;;  %v7354_v15 = vld [vmem:[#allocation55_spill] sm:$0xff]  ;;  %457 = vst.msk [vmem:[#allocation4] sm:$0xff] %vm169_vm0, %v5981_v12  ;;  %458 = vst.msk [vmem:[#allocation4 + $0x8] sm:$0xff] %vm169_vm0, %v5981_v12 }
 0x266   :  { %4897 = vmatprep.mubr.f32.mxu1 %v7348_v19  ;;  %5092 = vmatprep.mubr.f32.mxu0 %v7350_v50  ;;  %459 = vst.msk [vmem:[#allocation4 + $0x10] sm:$0xff] %vm169_vm0, %v5981_v12  ;;  %460 = vst.msk [vmem:[#allocation4 + $0x18] sm:$0xff] %vm169_vm0, %v5981_v12  ;;  %v510_v55 = vld [vmem:[#allocation3 + $0x28] sm:$0xff] }
 0x267   :  { %461 = vst.msk [vmem:[#allocation4 + $0x20] sm:$0xff] %vm169_vm0, %v5981_v12  ;;  %462 = vst.msk [vmem:[#allocation4 + $0x28] sm:$0xff] %vm169_vm0, %v5981_v12 }
 0x268   :  { %463 = vst.msk [vmem:[#allocation4 + $0x30] sm:$0xff] %vm169_vm0, %v5981_v12  ;;  %464 = vst.msk [vmem:[#allocation4 + $0x38] sm:$0xff] %vm169_vm0, %v5981_v12 }
 0x269   :  { %4898 = vmatmul.mubr.f32.gmra.mrb[24].mxu1 %v7349_v20  ;;  %5093 = vmatmul.mubr.f32.gmra.mrb[26].mxu0 %v7351_v61  ;;  %465 = vst.msk [vmem:[#allocation4 + $0x40] sm:$0xff] %vm169_vm0, %v5981_v12  ;;  %466 = vst.msk [vmem:[#allocation4 + $0x48] sm:$0xff] %vm169_vm0, %v5981_v12  ;;  %v509_v20 = vld [vmem:[#allocation3 + $0x20] sm:$0xff] }
 0x26a   :  { %4900 = vmatprep.mubr.f32.mxu1 %v7350_v50  ;;  %5095 = vmatprep.mubr.f32.mxu0 %v7352_v31  ;;  %467 = vst.msk [vmem:[#allocation4 + $0x50] sm:$0xff] %vm169_vm0, %v5981_v12  ;;  %468 = vst.msk [vmem:[#allocation4 + $0x58] sm:$0xff] %vm169_vm0, %v5981_v12 }
 0x26b   :  { %469 = vst.msk [vmem:[#allocation4 + $0x60] sm:$0xff] %vm169_vm0, %v5981_v12  ;;  %470 = vst.msk [vmem:[#allocation4 + $0x68] sm:$0xff] %vm169_vm0, %v5981_v12 }
 0x26c   :  { %471 = vst.msk [vmem:[#allocation4 + $0x70] sm:$0xff] %vm169_vm0, %v5981_v12  ;;  %472 = vst.msk [vmem:[#allocation4 + $0x78] sm:$0xff] %vm169_vm0, %v5981_v12 }
 0x26d   :  { %4901 = vmatmul.mubr.f32.gmra.mrb[26].mxu1 %v7351_v61  ;;  %5096 = vmatmul.mubr.f32.gmra.mrb[28].mxu0 %v7353_v8  ;;  %473 = vst.msk [vmem:[#allocation5] sm:$0xff] %vm169_vm0, %v5981_v12  ;;  %474 = vst.msk [vmem:[#allocation5 + $0x8] sm:$0xff] %vm169_vm0, %v5981_v12 }
 0x26e   :  { %4903 = vmatprep.mubr.f32.mxu1 %v7352_v31  ;;  %5098 = vmatprep.mubr.f32.mxu0 %v7354_v15  ;;  %475 = vst.msk [vmem:[#allocation5 + $0x10] sm:$0xff] %vm169_vm0, %v5981_v12  ;;  %476 = vst.msk [vmem:[#allocation5 + $0x18] sm:$0xff] %vm169_vm0, %v5981_v12 }
 0x26f   :  { %477 = vst.msk [vmem:[#allocation5 + $0x20] sm:$0xff] %vm169_vm0, %v5981_v12  ;;  %478 = vst.msk [vmem:[#allocation5 + $0x28] sm:$0xff] %vm169_vm0, %v5981_v12 }
 0x270   :  { %479 = vst.msk [vmem:[#allocation5 + $0x30] sm:$0xff] %vm169_vm0, %v5981_v12  ;;  %480 = vst.msk [vmem:[#allocation5 + $0x38] sm:$0xff] %vm169_vm0, %v5981_v12 }
 0x271   :  { %4904 = vmatmul.mubr.f32.gmra.mrb[28].mxu1 %v7353_v8  ;;  %5099 = vmatmul.mubr.f32.gmra.mrb[30].mxu0 %v7355_v48  ;;  %481 = vst.msk [vmem:[#allocation5 + $0x40] sm:$0xff] %vm169_vm0, %v5981_v12  ;;  %482 = vst.msk [vmem:[#allocation5 + $0x48] sm:$0xff] %vm169_vm0, %v5981_v12 }
 0x272   :  { %4906 = vmatprep.mubr.f32.mxu1 %v7354_v15  ;;  %5109 = vmatprep.mubr.f32.mxu0 %v7356_v60  ;;  %483 = vst.msk [vmem:[#allocation5 + $0x50] sm:$0xff] %vm169_vm0, %v5981_v12  ;;  %484 = vst.msk [vmem:[#allocation5 + $0x58] sm:$0xff] %vm169_vm0, %v5981_v12 }
 0x273   :  { %485 = vst.msk [vmem:[#allocation5 + $0x60] sm:$0xff] %vm169_vm0, %v5981_v12  ;;  %486 = vst.msk [vmem:[#allocation5 + $0x68] sm:$0xff] %vm169_vm0, %v5981_v12 }
 0x274   :  { %487 = vst.msk [vmem:[#allocation5 + $0x70] sm:$0xff] %vm169_vm0, %v5981_v12  ;;  %488 = vst.msk [vmem:[#allocation5 + $0x78] sm:$0xff] %vm169_vm0, %v5981_v12 }
 0x275   :  { %4907 = vmatmul.mubr.f32.gmra.mrb[30].mxu1 %v7355_v48  ;;  %5110 = vmatmul.mubr.f32.vlgmr.msra.gmra.mrb[16].mxu0 %v6370_v40  ;;  %v512_v48 = vld [vmem:[#allocation3 + $0x38] sm:$0xff] }
 0x276   :  { %4917 = vmatprep.mubr.f32.mxu1 %v7356_v60  ;;  %5112 = vmatprep.mubr.f32.mxu0 %v6378_v46 }
 0x277   :  { %5376 = vmatpush3.bf16.msra.mxu0 %v5373_v39 }
 0x278   :  { %5378 = vmatprep.subr.bf16.mxu0 %v5377_v37 }
 0x279   :  { %4918 = vmatmul.mubr.f32.vlgmr.msra.gmra.mrb[16].mxu1 %v6370_v40  ;;  %5113 = vmatmul.mubr.f32.gmra.mrb[18].mxu0 %v6399_v54 }
 0x27a   :  { %5328 = vmatpush3.bf16.msra.mxu1 %v5325_v62  ;;  %4920 = vmatprep.mubr.f32.mxu1 %v6378_v46 }
 0x27b   :  { %5115 = vmatprep.mubr.f32.mxu0 %v6423_v9  ;;  %5330 = vmatprep.subr.bf16.mxu1 %v5329_v23 }
 0x27c   :  { %5380 = vmatpush3.bf16.msra.mxu0 %v5377_v37 }
 0x27d   :  { %4921 = vmatmul.mubr.f32.gmra.mrb[18].mxu1 %v6399_v54  ;;  %5116 = vmatmul.mubr.f32.gmra.mrb[20].mxu0 %v6434_v36 }
 0x27e   :  { %4923 = vmatprep.mubr.f32.mxu1 %v6423_v9  ;;  %5118 = vmatprep.mubr.f32.mxu0 %v6461_v42 }
 0x27f   :  { %5332 = vmatpush3.bf16.msra.mxu1 %v5329_v23  ;;  %5382 = vmatprep.subr.bf16.mxu0 %v6655_v22 }
 0x280   :  { %5334 = vmatprep.subr.bf16.mxu1 %v6658_v58 }
 0x281   :  { %4924 = vmatmul.mubr.f32.gmra.mrb[20].mxu1 %v6434_v36  ;;  %5119 = vmatmul.mubr.f32.gmra.mrb[22].mxu0 %v6485_v56 }
 0x282   :  { %4926 = vmatprep.mubr.f32.mxu1 %v6461_v42  ;;  %5121 = vmatprep.mubr.f32.mxu0 %v6487_v25 }
 0x285   :  { %4927 = vmatmul.mubr.f32.gmra.mrb[22].mxu1 %v6485_v56  ;;  %5122 = vmatmul.mubr.f32.gmra.mrb[24].mxu0 %v6508_v35 }
 0x286   :  { %4929 = vmatprep.mubr.f32.mxu1 %v6487_v25  ;;  %5124 = vmatprep.mubr.f32.mxu0 %v6530_v30 }
 0x289   :  { %4930 = vmatmul.mubr.f32.gmra.mrb[24].mxu1 %v6508_v35  ;;  %5125 = vmatmul.mubr.f32.gmra.mrb[26].mxu0 %v6547_v24 }
 0x28a   :  { %4932 = vmatprep.mubr.f32.mxu1 %v6530_v30  ;;  %5127 = vmatprep.mubr.f32.mxu0 %v6557_v45 }
 0x28d   :  { %4933 = vmatmul.mubr.f32.gmra.mrb[26].mxu1 %v6547_v24  ;;  %5128 = vmatmul.mubr.f32.gmra.mrb[28].mxu0 %v6573_v0 }
 0x28e   :  { %4935 = vmatprep.mubr.f32.mxu1 %v6557_v45  ;;  %5130 = vmatprep.mubr.f32.mxu0 %v6583_v38 }
 0x291   :  { %4936 = vmatmul.mubr.f32.gmra.mrb[28].mxu1 %v6573_v0  ;;  %5131 = vmatmul.mubr.f32.gmra.mrb[30].mxu0 %v6606_v4 }
 0x292   :  { %4938 = vmatprep.mubr.f32.mxu1 %v6583_v38  ;;  %5141 = vmatprep.mubr.f32.mxu0 %v6365_v34 }
 0x295   :  { %4939 = vmatmul.mubr.f32.gmra.mrb[30].mxu1 %v6606_v4  ;;  %5142 = vmatmul.mubr.f32.vlgmr.msra.gmra.mrb[16].mxu0 %v6383_v49 }
 0x296   :  { %4949 = vmatprep.mubr.f32.mxu1 %v6365_v34  ;;  %5144 = vmatprep.mubr.f32.mxu0 %v6391_v52  ;;  %v7357_v34 = vand.u32 4294901760, %v6679_v63  ;;  %v7375_v63 = vld [vmem:[#allocation49_spill] sm:$0xff] }
 0x297   :  { %5384 = vmatpush3.bf16.msra.mxu0 %v6655_v22 }
 0x298   :  { %5386 = vmatprep.subr.bf16.mxu0 %v6705_v10  ;;  %v5389_v14 = vpack.c.bf16 %v7358_v51, %v7357_v34  ;;  %v511_v51 = vld [vmem:[#allocation3 + $0x30] sm:$0xff] }
 0x299   :  { %4950 = vmatmul.mubr.f32.vlgmr.msra.gmra.mrb[16].mxu1 %v6383_v49  ;;  %5145 = vmatmul.mubr.f32.gmra.mrb[18].mxu0 %v6415_v7  ;;  %v7360_v49 = vand.u32 4294901760, %v6685_v2  ;;  %v7362_v2 = vld [vmem:[#allocation34_spill] sm:$0xff] }
 0x29a   :  { %5336 = vmatpush3.bf16.msra.mxu1 %v6658_v58  ;;  %4952 = vmatprep.mubr.f32.mxu1 %v6391_v52  ;;  %v7361_v52 = vld [vmem:[#allocation33_spill] sm:$0xff] }
 0x29b   :  { %5147 = vmatprep.mubr.f32.mxu0 %v6441_v1  ;;  %5338 = vmatprep.subr.bf16.mxu1 %v6718_v11  ;;  %v5341_v41 = vpack.c.bf16 %v7360_v49, %v7359_v3 }
 0x29c   :  { %5388 = vmatpush3.bf16.msra.mxu0 %v6705_v10 }
 0x29d   :  { %4953 = vmatmul.mubr.f32.gmra.mrb[18].mxu1 %v6415_v7  ;;  %5148 = vmatmul.mubr.f32.gmra.mrb[20].mxu0 %v6459_v44  ;;  %v7363_v7 = vld [vmem:[#allocation35_spill] sm:$0xff] }
 0x29e   :  { %4955 = vmatprep.mubr.f32.mxu1 %v6441_v1  ;;  %5150 = vmatprep.mubr.f32.mxu0 %v6483_v26  ;;  %v5345_v1 = vpack.c.bf16 %v2009_v29, %v2002_v53  ;;  %v507_v53 = vld [vmem:[#allocation3 + $0x10] sm:$0xff] }
 0x29f   :  { %5340 = vmatpush3.bf16.msra.mxu1 %v6718_v11  ;;  %5390 = vmatprep.subr.bf16.mxu0 %v5389_v14 }
 0x2a0   :  { %5342 = vmatprep.subr.bf16.mxu1 %v5341_v41 }
 0x2a1   :  { %4956 = vmatmul.mubr.f32.gmra.mrb[20].mxu1 %v6459_v44  ;;  %5151 = vmatmul.mubr.f32.gmra.mrb[22].mxu0 %v6503_v17  ;;  %v7364_v44 = vld [vmem:[#allocation57_spill] sm:$0xff] }
 0x2a2   :  { %4958 = vmatprep.mubr.f32.mxu1 %v6483_v26  ;;  %5153 = vmatprep.mubr.f32.mxu0 %v6506_v59  ;;  %v7365_v26 = vld [vmem:[#allocation36_spill] sm:$0xff] }
 0x2a5   :  { %4959 = vmatmul.mubr.f32.gmra.mrb[22].mxu1 %v6503_v17  ;;  %5154 = vmatmul.mubr.f32.gmra.mrb[24].mxu0 %v6526_v27  ;;  %v7366_v17 = vld [vmem:[#allocation37_spill] sm:$0xff] }
 0x2a6   :  { %4961 = vmatprep.mubr.f32.mxu1 %v6506_v59  ;;  %5156 = vmatprep.mubr.f32.mxu0 %v6545_v43  ;;  %v7367_v59 = vld [vmem:[#allocation38_spill] sm:$0xff] }
 0x2a9   :  { %4962 = vmatmul.mubr.f32.gmra.mrb[24].mxu1 %v6526_v27  ;;  %5157 = vmatmul.mubr.f32.gmra.mrb[26].mxu0 %v6563_v57  ;;  %v7369_v27 = vld [vmem:[#allocation40_spill] sm:$0xff] }
 0x2aa   :  { %4964 = vmatprep.mubr.f32.mxu1 %v6545_v43  ;;  %5159 = vmatprep.mubr.f32.mxu0 %v6571_v6  ;;  %v7370_v43 = vld [vmem:[#allocation41_spill] sm:$0xff] }
 0x2ad   :  { %4965 = vmatmul.mubr.f32.gmra.mrb[26].mxu1 %v6563_v57  ;;  %5160 = vmatmul.mubr.f32.gmra.mrb[28].mxu0 %v6589_v21  ;;  %v7371_v57 = vld [vmem:[#allocation42_spill] sm:$0xff] }
 0x2ae   :  { %4967 = vmatprep.mubr.f32.mxu1 %v6571_v6  ;;  %5162 = vmatprep.mubr.f32.mxu0 %v6596_v28  ;;  %v7372_v6 = vld [vmem:[#allocation44_spill] sm:$0xff] }
 0x2b1   :  { %4968 = vmatmul.mubr.f32.gmra.mrb[28].mxu1 %v6589_v21  ;;  %5163 = vmatmul.mubr.f32.gmra.mrb[30].mxu0 %v6620_v16  ;;  %v7373_v21 = vld [vmem:[#allocation46_spill] sm:$0xff] }
 0x2b2   :  { %4970 = vmatprep.mubr.f32.mxu1 %v6596_v28  ;;  %5173 = vmatprep.mubr.f32.mxu0 %v7361_v52  ;;  %v7374_v28 = vld [vmem:[#allocation47_spill] sm:$0xff] }
 0x2b5   :  { %4971 = vmatmul.mubr.f32.gmra.mrb[30].mxu1 %v6620_v16  ;;  %5174 = vmatmul.mubr.f32.vlgmr.msra.gmra.mrb[16].mxu0 %v7362_v2  ;;  %v7368_v16 = vld [vmem:[#allocation39_spill] sm:$0xff] }
 0x2b6   :  { %4981 = vmatprep.mubr.f32.mxu1 %v7361_v52  ;;  %5176 = vmatprep.mubr.f32.mxu0 %v7363_v7 }
 0x2b7   :  { %5392 = vmatpush3.bf16.msra.mxu0 %v5389_v14 }
 0x2b8   :  { %5394 = vmatprep.subr.bf16.mxu0 %v7364_v44 }
 0x2b9   :  { %4982 = vmatmul.mubr.f32.vlgmr.msra.gmra.mrb[16].mxu1 %v7362_v2  ;;  %5177 = vmatmul.mubr.f32.gmra.mrb[18].mxu0 %v7365_v26 }
 0x2ba   :  { %5344 = vmatpush3.bf16.msra.mxu1 %v5341_v41  ;;  %4984 = vmatprep.mubr.f32.mxu1 %v7363_v7  ;;  %v514_v7 = vld [vmem:[#allocation3 + $0x48] sm:$0xff] }
 0x2bb   :  { %5179 = vmatprep.mubr.f32.mxu0 %v7366_v17  ;;  %5346 = vmatprep.subr.bf16.mxu1 %v5345_v1 }
 0x2bc   :  { %5396 = vmatpush3.bf16.msra.mxu0 %v7364_v44 }
 0x2bd   :  { %4985 = vmatmul.mubr.f32.gmra.mrb[18].mxu1 %v7365_v26  ;;  %5180 = vmatmul.mubr.f32.gmra.mrb[20].mxu0 %v7367_v59 }
 0x2be   :  { %4987 = vmatprep.mubr.f32.mxu1 %v7366_v17  ;;  %5182 = vmatprep.mubr.f32.mxu0 %v7368_v16 }
 0x2bf   :  { %5348 = vmatpush3.bf16.msra.mxu1 %v5345_v1  ;;  %5398 = vmatprep.subr.bf16.mxu0 %v6655_v22 }
 0x2c0   :  { %5350 = vmatprep.subr.bf16.mxu1 %v6658_v58 }
 0x2c1   :  { %4988 = vmatmul.mubr.f32.gmra.mrb[20].mxu1 %v7367_v59  ;;  %5183 = vmatmul.mubr.f32.gmra.mrb[22].mxu0 %v7369_v27 }
 0x2c2   :  { %4990 = vmatprep.mubr.f32.mxu1 %v7368_v16  ;;  %5185 = vmatprep.mubr.f32.mxu0 %v7370_v43  ;;  %v513_v16 = vld [vmem:[#allocation3 + $0x40] sm:$0xff] }
 0x2c5   :  { %4991 = vmatmul.mubr.f32.gmra.mrb[22].mxu1 %v7369_v27  ;;  %5186 = vmatmul.mubr.f32.gmra.mrb[24].mxu0 %v7371_v57 }
 0x2c6   :  { %4993 = vmatprep.mubr.f32.mxu1 %v7370_v43  ;;  %5188 = vmatprep.mubr.f32.mxu0 %v7372_v6 }
 0x2c9   :  { %4994 = vmatmul.mubr.f32.gmra.mrb[24].mxu1 %v7371_v57  ;;  %5189 = vmatmul.mubr.f32.gmra.mrb[26].mxu0 %v7373_v21 }
 0x2ca   :  { %4996 = vmatprep.mubr.f32.mxu1 %v7372_v6  ;;  %5191 = vmatprep.mubr.f32.mxu0 %v7374_v28 }
 0x2cd   :  { %4997 = vmatmul.mubr.f32.gmra.mrb[26].mxu1 %v7373_v21  ;;  %5192 = vmatmul.mubr.f32.gmra.mrb[28].mxu0 %v7375_v63 }
 0x2ce   :  { %4999 = vmatprep.mubr.f32.mxu1 %v7374_v28  ;;  %5194 = vmatprep.mubr.f32.mxu0 %v7376_v32 }
 0x2d1   :  { %5000 = vmatmul.mubr.f32.gmra.mrb[28].mxu1 %v7375_v63  ;;  %5195 = vmatmul.mubr.f32.gmra.mrb[30].mxu0 %v7377_v33 }
 0x2d2   :  { %5002 = vmatprep.mubr.f32.mxu1 %v7376_v32  ;;  %5205 = vmatprep.mubr.f32.mxu0 %v7356_v60  ;;  %v516_v32 = vld [vmem:[#allocation3 + $0x58] sm:$0xff] }
 0x2d5   :  { %5003 = vmatmul.mubr.f32.gmra.mrb[30].mxu1 %v7377_v33  ;;  %5206 = vmatmul.mubr.f32.vlgmr.msra.gmra.mrb[16].mxu0 %v6370_v40 }
 0x2d6   :  { %5013 = vmatprep.mubr.f32.mxu1 %v7356_v60  ;;  %5208 = vmatprep.mubr.f32.mxu0 %v6378_v46 }
 0x2d7   :  { %5400 = vmatpush3.bf16.msra.mxu0 %v6655_v22 }
 0x2d8   :  { %5402 = vmatprep.subr.bf16.mxu0 %v6705_v10 }
 0x2d9   :  { %5014 = vmatmul.mubr.f32.vlgmr.msra.gmra.mrb[16].mxu1 %v6370_v40  ;;  %5209 = vmatmul.mubr.f32.gmra.mrb[18].mxu0 %v6399_v54 }
 0x2da   :  { %5352 = vmatpush3.bf16.msra.mxu1 %v6658_v58  ;;  %5016 = vmatprep.mubr.f32.mxu1 %v6378_v46  ;;  %v508_v58 = vld [vmem:[#allocation3 + $0x18] sm:$0xff] }
 0x2db   :  { %5211 = vmatprep.mubr.f32.mxu0 %v6423_v9  ;;  %5354 = vmatprep.subr.bf16.mxu1 %v6718_v11 }
 0x2dc   :  { %5404 = vmatpush3.bf16.msra.mxu0 %v6705_v10 }
 0x2dd   :  { %5017 = vmatmul.mubr.f32.gmra.mrb[18].mxu1 %v6399_v54  ;;  %5212 = vmatmul.mubr.f32.gmra.mrb[20].mxu0 %v6434_v36 }
 0x2de   :  { %5019 = vmatprep.mubr.f32.mxu1 %v6423_v9  ;;  %5214 = vmatprep.mubr.f32.mxu0 %v6461_v42 }
 0x2df   :  { %5356 = vmatpush3.bf16.msra.mxu1 %v6718_v11 }
 0x2e1   :  { %5020 = vmatmul.mubr.f32.gmra.mrb[20].mxu1 %v6434_v36  ;;  %5215 = vmatmul.mubr.f32.gmra.mrb[22].mxu0 %v6485_v56 }
 0x2e2   :  { %5022 = vmatprep.mubr.f32.mxu1 %v6461_v42  ;;  %5217 = vmatprep.mubr.f32.mxu0 %v6487_v25 }
 0x2e5   :  { %5023 = vmatmul.mubr.f32.gmra.mrb[22].mxu1 %v6485_v56  ;;  %5218 = vmatmul.mubr.f32.gmra.mrb[24].mxu0 %v6508_v35 }
 0x2e6   :  { %5025 = vmatprep.mubr.f32.mxu1 %v6487_v25  ;;  %5220 = vmatprep.mubr.f32.mxu0 %v6530_v30 }
 0x2e9   :  { %5026 = vmatmul.mubr.f32.gmra.mrb[24].mxu1 %v6508_v35  ;;  %5221 = vmatmul.mubr.f32.gmra.mrb[26].mxu0 %v6547_v24 }
 0x2ea   :  { %5028 = vmatprep.mubr.f32.mxu1 %v6530_v30  ;;  %5223 = vmatprep.mubr.f32.mxu0 %v6557_v45 }
 0x2ed   :  { %5029 = vmatmul.mubr.f32.gmra.mrb[26].mxu1 %v6547_v24  ;;  %5224 = vmatmul.mubr.f32.gmra.mrb[28].mxu0 %v6573_v0 }
 0x2ee   :  { %5031 = vmatprep.mubr.f32.mxu1 %v6557_v45  ;;  %5226 = vmatprep.mubr.f32.mxu0 %v6583_v38 }
 0x2f1   :  { %5032 = vmatmul.mubr.f32.gmra.mrb[28].mxu1 %v6573_v0  ;;  %5227 = vmatmul.mubr.f32.gmra.mrb[30].mxu0 %v6606_v4 }
 0x2f2   :  { %5034 = vmatprep.mubr.f32.mxu1 %v6583_v38  ;;  %5237 = vmatprep.mubr.f32.mxu0 %v7356_v60 }
 0x2f5   :  { %5035 = vmatmul.mubr.f32.gmra.mrb[30].mxu1 %v6606_v4  ;;  %5238 = vmatmul.mubr.f32.vlgmr.msra.gmra.mrb[16].mxu0 %v6370_v40 }
 0x2f6   :  { %5045 = vmatprep.mubr.f32.mxu1 %v7356_v60  ;;  %5240 = vmatprep.mubr.f32.mxu0 %v6378_v46 }
 0x2f9   :  { %5046 = vmatmul.mubr.f32.vlgmr.msra.gmra.mrb[16].mxu1 %v6370_v40  ;;  %5241 = vmatmul.mubr.f32.gmra.mrb[18].mxu0 %v6399_v54 }
 0x2fa   :  { %5048 = vmatprep.mubr.f32.mxu1 %v6378_v46  ;;  %5243 = vmatprep.mubr.f32.mxu0 %v6423_v9 }
 0x2fd   :  { %5049 = vmatmul.mubr.f32.gmra.mrb[18].mxu1 %v6399_v54  ;;  %5244 = vmatmul.mubr.f32.gmra.mrb[20].mxu0 %v6434_v36  ;;  %v506_v54 = vld [vmem:[#allocation3 + $0x8] sm:$0xff] }
 0x2fe   :  { %5051 = vmatprep.mubr.f32.mxu1 %v6423_v9  ;;  %5246 = vmatprep.mubr.f32.mxu0 %v6461_v42 }
 0x301   :  { %5052 = vmatmul.mubr.f32.gmra.mrb[20].mxu1 %v6434_v36  ;;  %5247 = vmatmul.mubr.f32.gmra.mrb[22].mxu0 %v6485_v56 }
 0x302   :  { %5054 = vmatprep.mubr.f32.mxu1 %v6461_v42  ;;  %5249 = vmatprep.mubr.f32.mxu0 %v6487_v25  ;;  %v505_v42 = vld [vmem:[#allocation3] sm:$0xff] }
 0x305   :  { %5055 = vmatmul.mubr.f32.gmra.mrb[22].mxu1 %v6485_v56  ;;  %5250 = vmatmul.mubr.f32.gmra.mrb[24].mxu0 %v6508_v35 }
 0x306   :  { %5057 = vmatprep.mubr.f32.mxu1 %v6487_v25  ;;  %5252 = vmatprep.mubr.f32.mxu0 %v6530_v30 }
 0x308   :  { %v4855_v40 = vpop.f32.mrb[0].mxu0 }
 0x309   :  { %v1610_v46 = vpop.f32.mrb[1].mxu0  ;;  %5058 = vmatmul.mubr.f32.gmra.mrb[24].mxu1 %v6508_v35  ;;  %5253 = vmatmul.mubr.f32.gmra.mrb[26].mxu0 %v6547_v24 }
 0x30a   :  { %5060 = vmatprep.mubr.f32.mxu1 %v6530_v30  ;;  %5255 = vmatprep.mubr.f32.mxu0 %v6557_v45 }
 0x30c   :  { %v4759_v9 = vpop.f32.mrb[0].mxu1  ;;  %v4858_v22 = vpop.f32.mrb[2].mxu0 }
 0x30d   :  { %v5405_v36 = vadd.f32 %v4855_v40, %v4759_v9  ;;  %v1060_v56 = vpop.f32.mrb[1].mxu1  ;;  %v1622_v10 = vpop.f32.mrb[3].mxu0  ;;  %5061 = vmatmul.mubr.f32.gmra.mrb[26].mxu1 %v6547_v24  ;;  %5256 = vmatmul.mubr.f32.gmra.mrb[28].mxu0 %v6573_v0 }
 0x30e   :  { %v5406_v25 = vadd.f32 %v1610_v46, %v1060_v56  ;;  %5063 = vmatprep.mubr.f32.mxu1 %v6557_v45  ;;  %5258 = vmatprep.mubr.f32.mxu0 %v6583_v38 }
 0x30f   :  { %v1705_v35 = vadd.f32 %v5405_v36, %v506_v54 }
 0x310   :  { %v1704_v30 = vadd.f32 %v5406_v25, %v505_v42  ;;  %v4762_v11 = vpop.f32.mrb[2].mxu1  ;;  %v4861_v5 = vpop.f32.mrb[4].mxu0 }
 0x311   :  { %1721 = vst.msk [vmem:[#allocation3 + $0x8] sm:$0xff] %vm169_vm0, %v1705_v35  ;;  %v5407_v13 = vadd.f32 %v4858_v22, %v4762_v11  ;;  %v1074_v29 = vpop.f32.mrb[3].mxu1  ;;  %v1634_v47 = vpop.f32.mrb[5].mxu0  ;;  %5064 = vmatmul.mubr.f32.gmra.mrb[28].mxu1 %v6573_v0  ;;  %5259 = vmatmul.mubr.f32.gmra.mrb[30].mxu0 %v6606_v4  ;;  %v7056_v0 = vld [vmem:[#allocation17] ss:$0 sm:$0xff]  ;;  %v515_v22 = vld [vmem:[#allocation3 + $0x50] sm:$0xff] }
 0x312   :  { %1720 = vst.msk [vmem:[#allocation3] sm:$0xff] %vm169_vm0, %v1704_v30  ;;  %v5408_v24 = vadd.f32 %v1622_v10, %v1074_v29  ;;  %5066 = vmatprep.mubr.f32.mxu1 %v6583_v38 }
 0x313   :  { %v1707_v45 = vadd.f32 %v5407_v13, %v508_v58  ;;  %v518_v58 = vld [vmem:[#allocation3 + $0x68] sm:$0xff] }
 0x314   :  { %v1706_v18 = vadd.f32 %v5408_v24, %v507_v53  ;;  %v4765_v39 = vpop.f32.mrb[4].mxu1  ;;  %v4864_v62 = vpop.f32.mrb[6].mxu0 }
 0x315   :  { %1723 = vst.msk [vmem:[#allocation3 + $0x18] sm:$0xff] %vm169_vm0, %v1707_v45  ;;  %v5409_v19 = vadd.f32 %v4861_v5, %v4765_v39  ;;  %v1088_v50 = vpop.f32.mrb[5].mxu1  ;;  %v1646_v61 = vpop.f32.mrb[7].mxu0  ;;  %5067 = vmatmul.mubr.f32.gmra.mrb[30].mxu1 %v6606_v4 }
 0x316   :  { %1722 = vst.msk [vmem:[#allocation3 + $0x10] sm:$0xff] %vm169_vm0, %v1706_v18  ;;  %v5410_v31 = vadd.f32 %v1634_v47, %v1088_v50  ;;  %v517_v47 = vld [vmem:[#allocation3 + $0x60] sm:$0xff] }
 0x317   :  { %v1709_v8 = vadd.f32 %v5409_v19, %v510_v55 }
 0x318   :  { %v4104_v38 = vld [vmem:[#allocation3 + $0x8] sm:$0xff]  ;;  %v1708_v15 = vadd.f32 %v5410_v31, %v509_v20  ;;  %v4768_v60 = vpop.f32.mrb[6].mxu1  ;;  %v4867_v37 = vpop.f32.mrb[8].mxu0  ;;  %v520_v20 = vld [vmem:[#allocation3 + $0x78] sm:$0xff] }
 0x319   :  { %v4127_v23 = vadd.f32 %v7056_v0, %v4104_v38  ;;  %v4103_v12 = vld [vmem:[#allocation3] sm:$0xff]  ;;  %1725 = vst.msk [vmem:[#allocation3 + $0x28] sm:$0xff] %vm169_vm0, %v1709_v8  ;;  %v5411_v34 = vadd.f32 %v4864_v62, %v4768_v60  ;;  %v1102_v14 = vpop.f32.mrb[7].mxu1  ;;  %v1658_v4 = vpop.f32.mrb[9].mxu0  ;;  %v519_v38 = vld [vmem:[#allocation3 + $0x70] sm:$0xff] }
 0x31a   :  { %v4126_v3 = vadd.f32 %v7056_v0, %v4103_v12  ;;  %1724 = vst.msk [vmem:[#allocation3 + $0x20] sm:$0xff] %vm169_vm0, %v1708_v15  ;;  %v5412_v49 = vadd.f32 %v1646_v61, %v1102_v14 }
 0x31b   :  { %4143 = vst.msk [vmem:[#allocation21 + $0x8] sm:$0xff] %vm169_vm0, %v4127_v23  ;;  %v1711_v41 = vadd.f32 %v5411_v34, %v512_v48 }
 0x31c   :  { %4142 = vst.msk [vmem:[#allocation21] sm:$0xff] %vm169_vm0, %v4126_v3  ;;  %v4106_v52 = vld [vmem:[#allocation3 + $0x18] sm:$0xff]  ;;  %v1710_v2 = vadd.f32 %v5412_v49, %v511_v51  ;;  %v4771_v1 = vpop.f32.mrb[8].mxu1  ;;  %v4870_v44 = vpop.f32.mrb[10].mxu0 }
 0x31d   :  { %v4129_v26 = vadd.f32 %v7056_v0, %v4106_v52  ;;  %v4105_v17 = vld [vmem:[#allocation3 + $0x10] sm:$0xff]  ;;  %1727 = vst.msk [vmem:[#allocation3 + $0x38] sm:$0xff] %vm169_vm0, %v1711_v41  ;;  %v5413_v59 = vadd.f32 %v4867_v37, %v4771_v1  ;;  %v1116_v27 = vpop.f32.mrb[9].mxu1  ;;  %v1670_v43 = vpop.f32.mrb[11].mxu0 }
 0x31e   :  { %v4128_v57 = vadd.f32 %v7056_v0, %v4105_v17  ;;  %1726 = vst.msk [vmem:[#allocation3 + $0x30] sm:$0xff] %vm169_vm0, %v1710_v2  ;;  %v5414_v6 = vadd.f32 %v1658_v4, %v1116_v27 }
 0x31f   :  { %4145 = vst.msk [vmem:[#allocation21 + $0x18] sm:$0xff] %vm169_vm0, %v4129_v26  ;;  %v1713_v21 = vadd.f32 %v5413_v59, %v514_v7 }
 0x320   :  { %4144 = vst.msk [vmem:[#allocation21 + $0x10] sm:$0xff] %vm169_vm0, %v4128_v57  ;;  %v4108_v28 = vld [vmem:[#allocation3 + $0x28] sm:$0xff]  ;;  %v1712_v63 = vadd.f32 %v5414_v6, %v513_v16  ;;  %v4774_v33 = vpop.f32.mrb[10].mxu1  ;;  %v4873_v40 = vpop.f32.mrb[12].mxu0 }
 0x321   :  { %v4131_v46 = vadd.f32 %v7056_v0, %v4108_v28  ;;  %v4107_v54 = vld [vmem:[#allocation3 + $0x20] sm:$0xff]  ;;  %1729 = vst.msk [vmem:[#allocation3 + $0x48] sm:$0xff] %vm169_vm0, %v1713_v21  ;;  %v5415_v9 = vadd.f32 %v4870_v44, %v4774_v33  ;;  %v1130_v36 = vpop.f32.mrb[11].mxu1  ;;  %v1682_v42 = vpop.f32.mrb[13].mxu0 }
 0x322   :  { %v4130_v56 = vadd.f32 %v7056_v0, %v4107_v54  ;;  %1728 = vst.msk [vmem:[#allocation3 + $0x40] sm:$0xff] %vm169_vm0, %v1712_v63  ;;  %v5416_v10 = vadd.f32 %v1670_v43, %v1130_v36 }
 0x323   :  { %4147 = vst.msk [vmem:[#allocation21 + $0x28] sm:$0xff] %vm169_vm0, %v4131_v46  ;;  %v1715_v25 = vadd.f32 %v5415_v9, %v516_v32 }
 0x324   :  { %4146 = vst.msk [vmem:[#allocation21 + $0x20] sm:$0xff] %vm169_vm0, %v4130_v56  ;;  %v4110_v35 = vld [vmem:[#allocation3 + $0x38] sm:$0xff]  ;;  %v1714_v30 = vadd.f32 %v5416_v10, %v515_v22  ;;  %v4777_v11 = vpop.f32.mrb[12].mxu1  ;;  %v4876_v5 = vpop.f32.mrb[14].mxu0 }
 0x325   :  { %v4133_v13 = vadd.f32 %v7056_v0, %v4110_v35  ;;  %v4109_v53 = vld [vmem:[#allocation3 + $0x30] sm:$0xff]  ;;  %1731 = vst.msk [vmem:[#allocation3 + $0x58] sm:$0xff] %vm169_vm0, %v1715_v25  ;;  %v5417_v29 = vadd.f32 %v4873_v40, %v4777_v11  ;;  %v1144_v24 = vpop.f32.mrb[13].mxu1  ;;  %v1694_v45 = vpop.f32.mrb[15].mxu0 }
 0x326   :  { %v4132_v18 = vadd.f32 %v7056_v0, %v4109_v53  ;;  %1730 = vst.msk [vmem:[#allocation3 + $0x50] sm:$0xff] %vm169_vm0, %v1714_v30  ;;  %v5418_v55 = vadd.f32 %v1682_v42, %v1144_v24 }
 0x327   :  { %4149 = vst.msk [vmem:[#allocation21 + $0x38] sm:$0xff] %vm169_vm0, %v4133_v13  ;;  %v1717_v39 = vadd.f32 %v5417_v29, %v518_v58 }
 0x328   :  { %4148 = vst.msk [vmem:[#allocation21 + $0x30] sm:$0xff] %vm169_vm0, %v4132_v18  ;;  %v4112_v62 = vld [vmem:[#allocation3 + $0x48] sm:$0xff]  ;;  %v1716_v19 = vadd.f32 %v5418_v55, %v517_v47  ;;  %v4780_v50 = vpop.f32.mrb[14].mxu1 }
 0x329   :  { %v4135_v61 = vadd.f32 %v7056_v0, %v4112_v62  ;;  %v4111_v31 = vld [vmem:[#allocation3 + $0x40] sm:$0xff]  ;;  %1733 = vst.msk [vmem:[#allocation3 + $0x68] sm:$0xff] %vm169_vm0, %v1717_v39  ;;  %v5419_v8 = vadd.f32 %v4876_v5, %v4780_v50  ;;  %v1158_v15 = vpop.f32.mrb[15].mxu1 }
 0x32a   :  { %v4134_v48 = vadd.f32 %v7056_v0, %v4111_v31  ;;  %1732 = vst.msk [vmem:[#allocation3 + $0x60] sm:$0xff] %vm169_vm0, %v1716_v19  ;;  %v5420_v60 = vadd.f32 %v1694_v45, %v1158_v15 }
 0x32b   :  { %4151 = vst.msk [vmem:[#allocation21 + $0x48] sm:$0xff] %vm169_vm0, %v4135_v61  ;;  %v1719_v37 = vadd.f32 %v5419_v8, %v520_v20 }
 0x32c   :  { %4150 = vst.msk [vmem:[#allocation21 + $0x40] sm:$0xff] %vm169_vm0, %v4134_v48  ;;  %v4114_v23 = vld [vmem:[#allocation3 + $0x58] sm:$0xff]  ;;  %v1718_v12 = vadd.f32 %v5420_v60, %v519_v38 }
 0x32d   :  { %v4137_v34 = vadd.f32 %v7056_v0, %v4114_v23  ;;  %v4113_v51 = vld [vmem:[#allocation3 + $0x50] sm:$0xff]  ;;  %1735 = vst.msk [vmem:[#allocation3 + $0x78] sm:$0xff] %vm169_vm0, %v1719_v37 }
 0x32e   :  { %v4136_v14 = vadd.f32 %v7056_v0, %v4113_v51  ;;  %1734 = vst.msk [vmem:[#allocation3 + $0x70] sm:$0xff] %vm169_vm0, %v1718_v12 }
 0x32f   :  { %4153 = vst.msk [vmem:[#allocation21 + $0x58] sm:$0xff] %vm169_vm0, %v4137_v34 }
 0x330   :  { %4152 = vst.msk [vmem:[#allocation21 + $0x50] sm:$0xff] %vm169_vm0, %v4136_v14  ;;  %v4116_v4 = vld [vmem:[#allocation3 + $0x68] sm:$0xff] }
 0x331   :  { %v4139_v3 = vadd.f32 %v7056_v0, %v4116_v4  ;;  %v4115_v49 = vld [vmem:[#allocation3 + $0x60] sm:$0xff] }
 0x332   :  { %v4138_v41 = vadd.f32 %v7056_v0, %v4115_v49 }
 0x333   :  { %4155 = vst.msk [vmem:[#allocation21 + $0x68] sm:$0xff] %vm169_vm0, %v4139_v3 }
 0x334   :  { %4154 = vst.msk [vmem:[#allocation21 + $0x60] sm:$0xff] %vm169_vm0, %v4138_v41  ;;  %v4118_v52 = vld [vmem:[#allocation3 + $0x78] sm:$0xff] }
 0x335   :  { %v4141_v2 = vadd.f32 %v7056_v0, %v4118_v52  ;;  %v4117_v7 = vld [vmem:[#allocation3 + $0x70] sm:$0xff] }
 0x336   :  { %v4140_v1 = vadd.f32 %v7056_v0, %v4117_v7 }
 0x337   :  { %4157 = vst.msk [vmem:[#allocation21 + $0x78] sm:$0xff] %vm169_vm0, %v4141_v2 }
 0x338   :  { %4156 = vst.msk [vmem:[#allocation21 + $0x70] sm:$0xff] %vm169_vm0, %v4140_v1 }
 0x339   :  { %5901 = shalt.err (!%p5898_p6)
}
 0x33a   :  { %s5902_s29 = scalar_lea.hbm %s7264_s9, 2048 }
 0x33b   :  { %p5903_p7 = scmp.ne.s32.totalorder %s7264_s9, %s5902_s29  ;;  %p5906_p8 = scmp.lt.u32.totalorder %s5902_s29, %s7264_s9 }
 0x33d   :  { %p5908_p9 = pnand %p5906_p8, %p5903_p7 }
 0x33f   :  { %5911 = shalt.err (!%p5908_p9)
}
 0x340   :  { %4279 = dma.vmem_to_hbm [thread:$0]  %s4274_s27, 2048, %s7264_s9, [#allocation8], %s5973_s18, %s5973_s18, %s5974_s23   ;;  %v2919_v0 = vld [vmem:[#allocation5 + $0x8] sm:$0xff]  ;;  %v2918_v44 = vld [vmem:[#allocation5] sm:$0xff]  ;;  %v2921_v43 = vld [vmem:[#allocation5 + $0x18] sm:$0xff] }
 0x341   :  { %v1737_v27 = vld [vmem:[#allocation4 + $0x8] sm:$0xff]  ;;  %v1736_v57 = vld [vmem:[#allocation4] sm:$0xff]  ;;  %v2920_v6 = vld [vmem:[#allocation5 + $0x10] sm:$0xff]  ;;  %s5983_s9 = smov [#allocation22]   ;;  %s5984_s16 = smov [#allocation24]  }
 0x342   :  { %v1739_v9 = vld [vmem:[#allocation4 + $0x18] sm:$0xff]  ;;  %v2923_v22 = vld [vmem:[#allocation5 + $0x28] sm:$0xff]  ;;  %v1738_v36 = vld [vmem:[#allocation4 + $0x10] sm:$0xff]  ;;  %s4285_s26 = sshll.u32 %s5983_s9, 4  ;;  %s4297_s3 = sshll.u32 %s5984_s16, 4  ;;  %s4286_s26 = int_to_ptr.vmem [resolvable:$true] %s4285_s26  ;;  %s7217_s3 = int_to_ptr.vmem [resolvable:$true] %s4297_s3 }
 0x343   :  { %v2922_v42 = vld [vmem:[#allocation5 + $0x20] sm:$0xff]  ;;  %v7122_v56 = vld [vmem:[#allocation20] ss:$0 sm:$0xff]  ;;  %v2925_v47 = vld [vmem:[#allocation5 + $0x38] sm:$0xff]  ;;  %s5912_s12 = scalar_lea.vmem %s4286_s26, 2048  ;;  %p5917_p11 = scmp.lt.s32.totalorder %s4286_s26, %s4286_s26 }
 0x344   :  { %v1741_v29 = vld [vmem:[#allocation4 + $0x28] sm:$0xff]  ;;  %v1740_v18 = vld [vmem:[#allocation4 + $0x20] sm:$0xff]  ;;  %v2924_v55 = vld [vmem:[#allocation5 + $0x30] sm:$0xff]  ;;  %p5913_p10 = scmp.ne.s32.totalorder %s4286_s26, %s5912_s12  ;;  %p5918_p12 = scmp.lt.s32.totalorder %s5912_s12, %s5912_s12 }
 0x345   :  { %v7130_v62 = vld [vmem:[#allocation18] ss:$0 sm:$0xff]  ;;  %v1743_v38 = vld [vmem:[#allocation4 + $0x38] sm:$0xff]  ;;  %v2927_v15 = vld [vmem:[#allocation5 + $0x48] sm:$0xff] }
 0x346   :  { %v1742_v12 = vld [vmem:[#allocation4 + $0x30] sm:$0xff]  ;;  %v2926_v3 = vld [vmem:[#allocation5 + $0x40] sm:$0xff]  ;;  %p5919_p13 = por %p5918_p12, %p5917_p11 }
 0x348   :  { %p5920_p0 = pnand %p5919_p13, %p5913_p10 }
 0x3c8   :  { %v5239_v26 = vpop.f32.mrb[16].mxu0 }
 0x3c9   :  { %v4069_v17 = vadd.f32 %v5239_v26, %v2919_v0  ;;  %v3974_v59 = vpop.f32.mrb[17].mxu0  ;;  %v1745_v26 = vld [vmem:[#allocation4 + $0x48] sm:$0xff] }
 0x3ca   :  { %v4068_v16 = vadd.f32 %v3974_v59, %v2918_v44 }
 0x3cb   :  { %4085 = vst.msk [vmem:[#allocation5 + $0x8] sm:$0xff] %vm169_vm0, %v4069_v17  ;;  %v2929_v17 = vld [vmem:[#allocation5 + $0x58] sm:$0xff] }
 0x3cc   :  { %4084 = vst.msk [vmem:[#allocation5] sm:$0xff] %vm169_vm0, %v4068_v16  ;;  %v5047_v21 = vpop.f32.mrb[16].mxu1  ;;  %v5242_v28 = vpop.f32.mrb[18].mxu0 }
 0x3cd   :  { %v2887_v63 = vadd.f32 %v5047_v21, %v1737_v27  ;;  %v4071_v32 = vadd.f32 %v5242_v28, %v2921_v43  ;;  %v2792_v33 = vpop.f32.mrb[17].mxu1  ;;  %v3986_v40 = vpop.f32.mrb[19].mxu0 }
 0x3ce   :  { %v2886_v46 = vadd.f32 %v2792_v33, %v1736_v57  ;;  %v4070_v54 = vadd.f32 %v3986_v40, %v2920_v6  ;;  %v1744_v57 = vld [vmem:[#allocation4 + $0x40] sm:$0xff] }
 0x3cf   :  { %2903 = vst.msk [vmem:[#allocation4 + $0x8] sm:$0xff] %vm169_vm0, %v2887_v63  ;;  %4087 = vst.msk [vmem:[#allocation5 + $0x18] sm:$0xff] %vm169_vm0, %v4071_v32  ;;  %v2928_v32 = vld [vmem:[#allocation5 + $0x50] sm:$0xff] }
 0x3d0   :  { %2902 = vst.msk [vmem:[#allocation4] sm:$0xff] %vm169_vm0, %v2886_v46  ;;  %4086 = vst.msk [vmem:[#allocation5 + $0x10] sm:$0xff] %vm169_vm0, %v4070_v54  ;;  %v5050_v10 = vpop.f32.mrb[18].mxu1  ;;  %v5245_v25 = vpop.f32.mrb[20].mxu0 }
 0x3d1   :  { %v2889_v35 = vadd.f32 %v5050_v10, %v1739_v9  ;;  %v4073_v30 = vadd.f32 %v5245_v25, %v2923_v22  ;;  %v2804_v58 = vpop.f32.mrb[19].mxu1  ;;  %v3998_v11 = vpop.f32.mrb[21].mxu0  ;;  %v1747_v10 = vld [vmem:[#allocation4 + $0x58] sm:$0xff]  ;;  %v2931_v25 = vld [vmem:[#allocation5 + $0x68] sm:$0xff] }
 0x3d2   :  { %v4214_v5 = vld [vmem:[#allocation5 + $0x8] sm:$0xff]  ;;  %v2888_v13 = vadd.f32 %v2804_v58, %v1738_v36  ;;  %v4072_v53 = vadd.f32 %v3998_v11, %v2922_v42 }
 0x3d3   :  { %v4237_v24 = vadd.f32 %v7122_v56, %v4214_v5  ;;  %v4213_v45 = vld [vmem:[#allocation5] sm:$0xff]  ;;  %2905 = vst.msk [vmem:[#allocation4 + $0x18] sm:$0xff] %vm169_vm0, %v2889_v35  ;;  %4089 = vst.msk [vmem:[#allocation5 + $0x28] sm:$0xff] %vm169_vm0, %v4073_v30  ;;  %v1746_v5 = vld [vmem:[#allocation4 + $0x50] sm:$0xff] }
 0x3d4   :  { %v4236_v39 = vadd.f32 %v7122_v56, %v4213_v45  ;;  %2904 = vst.msk [vmem:[#allocation4 + $0x10] sm:$0xff] %vm169_vm0, %v2888_v13  ;;  %4088 = vst.msk [vmem:[#allocation5 + $0x20] sm:$0xff] %vm169_vm0, %v4072_v53  ;;  %v5053_v19 = vpop.f32.mrb[20].mxu1  ;;  %v5248_v20 = vpop.f32.mrb[22].mxu0 }
 0x3d5   :  { %4253 = vst.msk [vmem:[#allocation24 + $0x8] sm:$0xff] %vm169_vm0, %v4237_v24  ;;  %v2891_v50 = vadd.f32 %v5053_v19, %v1741_v29  ;;  %v4075_v61 = vadd.f32 %v5248_v20, %v2925_v47  ;;  %v2816_v31 = vpop.f32.mrb[21].mxu1  ;;  %v4010_v8 = vpop.f32.mrb[23].mxu0  ;;  %v2930_v24 = vld [vmem:[#allocation5 + $0x60] sm:$0xff] }
 0x3d6   :  { %4252 = vst.msk [vmem:[#allocation24] sm:$0xff] %vm169_vm0, %v4236_v39  ;;  %v4159_v48 = vld [vmem:[#allocation4 + $0x8] sm:$0xff]  ;;  %v4216_v60 = vld [vmem:[#allocation5 + $0x18] sm:$0xff]  ;;  %v2890_v37 = vadd.f32 %v2816_v31, %v1740_v18  ;;  %v4074_v23 = vadd.f32 %v4010_v8, %v2924_v55 }
 0x3d7   :  { %v4182_v34 = vadd.f32 %v7130_v62, %v4159_v48  ;;  %v4239_v51 = vadd.f32 %v7122_v56, %v4216_v60  ;;  %v4158_v14 = vld [vmem:[#allocation4] sm:$0xff]  ;;  %v4215_v4 = vld [vmem:[#allocation5 + $0x10] sm:$0xff]  ;;  %2907 = vst.msk [vmem:[#allocation4 + $0x28] sm:$0xff] %vm169_vm0, %v2891_v50  ;;  %4091 = vst.msk [vmem:[#allocation5 + $0x38] sm:$0xff] %vm169_vm0, %v4075_v61 }
 0x3d8   :  { %v4181_v49 = vadd.f32 %v7130_v62, %v4158_v14  ;;  %v4238_v41 = vadd.f32 %v7122_v56, %v4215_v4  ;;  %2906 = vst.msk [vmem:[#allocation4 + $0x20] sm:$0xff] %vm169_vm0, %v2890_v37  ;;  %4090 = vst.msk [vmem:[#allocation5 + $0x30] sm:$0xff] %vm169_vm0, %v4074_v23  ;;  %v5056_v52 = vpop.f32.mrb[22].mxu1  ;;  %v5251_v2 = vpop.f32.mrb[24].mxu0  ;;  %v1749_v31 = vld [vmem:[#allocation4 + $0x68] sm:$0xff]  ;;  %v2933_v8 = vld [vmem:[#allocation5 + $0x78] sm:$0xff] }
 0x3d9   :  { %4198 = vst.msk [vmem:[#allocation22 + $0x8] sm:$0xff] %vm169_vm0, %v4182_v34  ;;  %4255 = vst.msk [vmem:[#allocation24 + $0x18] sm:$0xff] %vm169_vm0, %v4239_v51  ;;  %v2893_v7 = vadd.f32 %v5056_v52, %v1743_v38  ;;  %v4077_v1 = vadd.f32 %v5251_v2, %v2927_v15  ;;  %v2828_v0 = vpop.f32.mrb[23].mxu1  ;;  %v4022_v44 = vpop.f32.mrb[25].mxu0  ;;  %v1748_v37 = vld [vmem:[#allocation4 + $0x60] sm:$0xff]  ;;  %v2932_v14 = vld [vmem:[#allocation5 + $0x70] sm:$0xff] }
 0x3da   :  { %4197 = vst.msk [vmem:[#allocation22] sm:$0xff] %vm169_vm0, %v4181_v49  ;;  %4254 = vst.msk [vmem:[#allocation24 + $0x10] sm:$0xff] %vm169_vm0, %v4238_v41  ;;  %v4161_v59 = vld [vmem:[#allocation4 + $0x18] sm:$0xff]  ;;  %v4218_v16 = vld [vmem:[#allocation5 + $0x28] sm:$0xff]  ;;  %v2892_v27 = vadd.f32 %v2828_v0, %v1742_v12  ;;  %v4076_v43 = vadd.f32 %v4022_v44, %v2926_v3 }
 0x3db   :  { %v4184_v6 = vadd.f32 %v7130_v62, %v4161_v59  ;;  %v4241_v21 = vadd.f32 %v7122_v56, %v4218_v16  ;;  %v4160_v28 = vld [vmem:[#allocation4 + $0x10] sm:$0xff]  ;;  %v4217_v63 = vld [vmem:[#allocation5 + $0x20] sm:$0xff]  ;;  %2909 = vst.msk [vmem:[#allocation4 + $0x38] sm:$0xff] %vm169_vm0, %v2893_v7  ;;  %4093 = vst.msk [vmem:[#allocation5 + $0x48] sm:$0xff] %vm169_vm0, %v4077_v1 }
 0x3dc   :  { %v4183_v33 = vadd.f32 %v7130_v62, %v4160_v28  ;;  %v4240_v40 = vadd.f32 %v7122_v56, %v4217_v63  ;;  %2908 = vst.msk [vmem:[#allocation4 + $0x30] sm:$0xff] %vm169_vm0, %v2892_v27  ;;  %4092 = vst.msk [vmem:[#allocation5 + $0x40] sm:$0xff] %vm169_vm0, %v4076_v43  ;;  %v5059_v46 = vpop.f32.mrb[24].mxu1  ;;  %v5254_v54 = vpop.f32.mrb[26].mxu0  ;;  %v1751_v59 = vld [vmem:[#allocation4 + $0x78] sm:$0xff] }
 0x3dd   :  { %4200 = vst.msk [vmem:[#allocation22 + $0x18] sm:$0xff] %vm169_vm0, %v4184_v6  ;;  %4257 = vst.msk [vmem:[#allocation24 + $0x28] sm:$0xff] %vm169_vm0, %v4241_v21  ;;  %v2895_v9 = vadd.f32 %v5059_v46, %v1745_v26  ;;  %v4079_v22 = vadd.f32 %v5254_v54, %v2929_v17  ;;  %v2840_v36 = vpop.f32.mrb[25].mxu1  ;;  %v4034_v42 = vpop.f32.mrb[27].mxu0  ;;  %v1750_v6 = vld [vmem:[#allocation4 + $0x70] sm:$0xff] }
 0x3de   :  { %4199 = vst.msk [vmem:[#allocation22 + $0x10] sm:$0xff] %vm169_vm0, %v4183_v33  ;;  %4256 = vst.msk [vmem:[#allocation24 + $0x20] sm:$0xff] %vm169_vm0, %v4240_v40  ;;  %v4163_v35 = vld [vmem:[#allocation4 + $0x28] sm:$0xff]  ;;  %v4220_v30 = vld [vmem:[#allocation5 + $0x38] sm:$0xff]  ;;  %v2894_v58 = vadd.f32 %v2840_v36, %v1744_v57  ;;  %v4078_v11 = vadd.f32 %v4034_v42, %v2928_v32 }
 0x3df   :  { %v4186_v13 = vadd.f32 %v7130_v62, %v4163_v35  ;;  %v4243_v53 = vadd.f32 %v7122_v56, %v4220_v30  ;;  %v4162_v29 = vld [vmem:[#allocation4 + $0x20] sm:$0xff]  ;;  %v4219_v47 = vld [vmem:[#allocation5 + $0x30] sm:$0xff]  ;;  %2911 = vst.msk [vmem:[#allocation4 + $0x48] sm:$0xff] %vm169_vm0, %v2895_v9  ;;  %4095 = vst.msk [vmem:[#allocation5 + $0x58] sm:$0xff] %vm169_vm0, %v4079_v22 }
 0x3e0   :  { %v4185_v45 = vadd.f32 %v7130_v62, %v4162_v29  ;;  %v4242_v18 = vadd.f32 %v7122_v56, %v4219_v47  ;;  %2910 = vst.msk [vmem:[#allocation4 + $0x40] sm:$0xff] %vm169_vm0, %v2894_v58  ;;  %4094 = vst.msk [vmem:[#allocation5 + $0x50] sm:$0xff] %vm169_vm0, %v4078_v11  ;;  %v5062_v55 = vpop.f32.mrb[26].mxu1  ;;  %v5257_v39 = vpop.f32.mrb[28].mxu0 }
 0x3e1   :  { %4202 = vst.msk [vmem:[#allocation22 + $0x28] sm:$0xff] %vm169_vm0, %v4186_v13  ;;  %4259 = vst.msk [vmem:[#allocation24 + $0x38] sm:$0xff] %vm169_vm0, %v4243_v53  ;;  %v2897_v19 = vadd.f32 %v5062_v55, %v1747_v10  ;;  %v4081_v20 = vadd.f32 %v5257_v39, %v2931_v25  ;;  %v2852_v50 = vpop.f32.mrb[27].mxu1  ;;  %v4046_v61 = vpop.f32.mrb[29].mxu0 }
 0x3e2   :  { %4201 = vst.msk [vmem:[#allocation22 + $0x20] sm:$0xff] %vm169_vm0, %v4185_v45  ;;  %4258 = vst.msk [vmem:[#allocation24 + $0x30] sm:$0xff] %vm169_vm0, %v4242_v18  ;;  %v4165_v38 = vld [vmem:[#allocation4 + $0x38] sm:$0xff]  ;;  %v4222_v15 = vld [vmem:[#allocation5 + $0x48] sm:$0xff]  ;;  %v2896_v48 = vadd.f32 %v2852_v50, %v1746_v5  ;;  %v4080_v60 = vadd.f32 %v4046_v61, %v2930_v24 }
 0x3e3   :  { %v4188_v23 = vadd.f32 %v7130_v62, %v4165_v38  ;;  %v4245_v12 = vadd.f32 %v7122_v56, %v4222_v15  ;;  %v4164_v34 = vld [vmem:[#allocation4 + $0x30] sm:$0xff]  ;;  %v4221_v51 = vld [vmem:[#allocation5 + $0x40] sm:$0xff]  ;;  %2913 = vst.msk [vmem:[#allocation4 + $0x58] sm:$0xff] %vm169_vm0, %v2897_v19  ;;  %4097 = vst.msk [vmem:[#allocation5 + $0x68] sm:$0xff] %vm169_vm0, %v4081_v20 }
 0x3e4   :  { %v4187_v4 = vadd.f32 %v7130_v62, %v4164_v34  ;;  %v4244_v3 = vadd.f32 %v7122_v56, %v4221_v51  ;;  %2912 = vst.msk [vmem:[#allocation4 + $0x50] sm:$0xff] %vm169_vm0, %v2896_v48  ;;  %4096 = vst.msk [vmem:[#allocation5 + $0x60] sm:$0xff] %vm169_vm0, %v4080_v60  ;;  %v5065_v49 = vpop.f32.mrb[28].mxu1  ;;  %v5260_v41 = vpop.f32.mrb[30].mxu0 }
 0x3e5   :  { %4204 = vst.msk [vmem:[#allocation22 + $0x38] sm:$0xff] %vm169_vm0, %v4188_v23  ;;  %4261 = vst.msk [vmem:[#allocation24 + $0x48] sm:$0xff] %vm169_vm0, %v4245_v12  ;;  %v2899_v52 = vadd.f32 %v5065_v49, %v1749_v31  ;;  %v4083_v2 = vadd.f32 %v5260_v41, %v2933_v8  ;;  %v2864_v7 = vpop.f32.mrb[29].mxu1  ;;  %v4058_v1 = vpop.f32.mrb[31].mxu0 }
 0x3e6   :  { %4203 = vst.msk [vmem:[#allocation22 + $0x30] sm:$0xff] %vm169_vm0, %v4187_v4  ;;  %4260 = vst.msk [vmem:[#allocation24 + $0x40] sm:$0xff] %vm169_vm0, %v4244_v3  ;;  %v4167_v0 = vld [vmem:[#allocation4 + $0x48] sm:$0xff]  ;;  %v4224_v44 = vld [vmem:[#allocation5 + $0x58] sm:$0xff]  ;;  %v2898_v26 = vadd.f32 %v2864_v7, %v1748_v37  ;;  %v4082_v17 = vadd.f32 %v4058_v1, %v2932_v14 }
 0x3e7   :  { %v4190_v16 = vadd.f32 %v7130_v62, %v4167_v0  ;;  %v4247_v27 = vadd.f32 %v7122_v56, %v4224_v44  ;;  %v4166_v43 = vld [vmem:[#allocation4 + $0x40] sm:$0xff]  ;;  %v4223_v57 = vld [vmem:[#allocation5 + $0x50] sm:$0xff]  ;;  %2915 = vst.msk [vmem:[#allocation4 + $0x68] sm:$0xff] %vm169_vm0, %v2899_v52  ;;  %4099 = vst.msk [vmem:[#allocation5 + $0x78] sm:$0xff] %vm169_vm0, %v4083_v2 }
 0x3e8   :  { %v4189_v21 = vadd.f32 %v7130_v62, %v4166_v43  ;;  %v4246_v28 = vadd.f32 %v7122_v56, %v4223_v57  ;;  %2914 = vst.msk [vmem:[#allocation4 + $0x60] sm:$0xff] %vm169_vm0, %v2898_v26  ;;  %4098 = vst.msk [vmem:[#allocation5 + $0x70] sm:$0xff] %vm169_vm0, %v4082_v17  ;;  %v5068_v63 = vpop.f32.mrb[30].mxu1 }
 0x3e9   :  { %4206 = vst.msk [vmem:[#allocation22 + $0x48] sm:$0xff] %vm169_vm0, %v4190_v16  ;;  %4263 = vst.msk [vmem:[#allocation24 + $0x58] sm:$0xff] %vm169_vm0, %v4247_v27  ;;  %v2901_v32 = vadd.f32 %v5068_v63, %v1751_v59  ;;  %v2876_v33 = vpop.f32.mrb[31].mxu1 }
 0x3ea   :  { %4205 = vst.msk [vmem:[#allocation22 + $0x40] sm:$0xff] %vm169_vm0, %v4189_v21  ;;  %4262 = vst.msk [vmem:[#allocation24 + $0x50] sm:$0xff] %vm169_vm0, %v4246_v28  ;;  %v4169_v40 = vld [vmem:[#allocation4 + $0x58] sm:$0xff]  ;;  %v4226_v46 = vld [vmem:[#allocation5 + $0x68] sm:$0xff]  ;;  %v2900_v54 = vadd.f32 %v2876_v33, %v1750_v6 }
 0x3eb   :  { %v4192_v9 = vadd.f32 %v7130_v62, %v4169_v40  ;;  %v4249_v22 = vadd.f32 %v7122_v56, %v4226_v46  ;;  %v4168_v36 = vld [vmem:[#allocation4 + $0x50] sm:$0xff]  ;;  %v4225_v42 = vld [vmem:[#allocation5 + $0x60] sm:$0xff]  ;;  %2917 = vst.msk [vmem:[#allocation4 + $0x78] sm:$0xff] %vm169_vm0, %v2901_v32 }
 0x3ec   :  { %v4191_v10 = vadd.f32 %v7130_v62, %v4168_v36  ;;  %v4248_v25 = vadd.f32 %v7122_v56, %v4225_v42  ;;  %2916 = vst.msk [vmem:[#allocation4 + $0x70] sm:$0xff] %vm169_vm0, %v2900_v54 }
 0x3ed   :  { %4208 = vst.msk [vmem:[#allocation22 + $0x58] sm:$0xff] %vm169_vm0, %v4192_v9  ;;  %4265 = vst.msk [vmem:[#allocation24 + $0x68] sm:$0xff] %vm169_vm0, %v4249_v22 }
 0x3ee   :  { %4207 = vst.msk [vmem:[#allocation22 + $0x50] sm:$0xff] %vm169_vm0, %v4191_v10  ;;  %4264 = vst.msk [vmem:[#allocation24 + $0x60] sm:$0xff] %vm169_vm0, %v4248_v25  ;;  %v4171_v35 = vld [vmem:[#allocation4 + $0x68] sm:$0xff]  ;;  %v4228_v30 = vld [vmem:[#allocation5 + $0x78] sm:$0xff] }
 0x3ef   :  { %v4194_v58 = vadd.f32 %v7130_v62, %v4171_v35  ;;  %v4251_v11 = vadd.f32 %v7122_v56, %v4228_v30  ;;  %v4170_v5 = vld [vmem:[#allocation4 + $0x60] sm:$0xff]  ;;  %v4227_v13 = vld [vmem:[#allocation5 + $0x70] sm:$0xff] }
 0x3f0   :  { %v4193_v53 = vadd.f32 %v7130_v62, %v4170_v5  ;;  %v4250_v29 = vadd.f32 %v7122_v56, %v4227_v13 }
 0x3f1   :  { %4210 = vst.msk [vmem:[#allocation22 + $0x68] sm:$0xff] %vm169_vm0, %v4194_v58  ;;  %4267 = vst.msk [vmem:[#allocation24 + $0x78] sm:$0xff] %vm169_vm0, %v4251_v11 }
 0x3f2   :  { %4209 = vst.msk [vmem:[#allocation22 + $0x60] sm:$0xff] %vm169_vm0, %v4193_v53  ;;  %4266 = vst.msk [vmem:[#allocation24 + $0x70] sm:$0xff] %vm169_vm0, %v4250_v29  ;;  %v4173_v47 = vld [vmem:[#allocation4 + $0x78] sm:$0xff] }
 0x3f3   :  { %v4196_v24 = vadd.f32 %v7130_v62, %v4173_v47  ;;  %v4172_v45 = vld [vmem:[#allocation4 + $0x70] sm:$0xff] }
 0x3f4   :  { %v4195_v18 = vadd.f32 %v7130_v62, %v4172_v45 }
 0x3f5   :  { %4212 = vst.msk [vmem:[#allocation22 + $0x78] sm:$0xff] %vm169_vm0, %v4196_v24 }
 0x3f6   :  { %4211 = vst.msk [vmem:[#allocation22 + $0x70] sm:$0xff] %vm169_vm0, %v4195_v18 }
 0x3f7   :  { %5923 = shalt.err (!%p5920_p0)
}
 0x3f8   :  { %s5924_s22 = scalar_lea.hbm %s7265_s10, 2048 }
 0x3f9   :  { %p5925_p1 = scmp.ne.s32.totalorder %s7265_s10, %s5924_s22  ;;  %p5928_p2 = scmp.lt.u32.totalorder %s5924_s22, %s7265_s10 }
 0x3fb   :  { %p5930_p3 = pnand %p5928_p2, %p5925_p1 }
 0x3fd   :  { %5933 = shalt.err (!%p5930_p3)
}
 0x3fe   :  { %4291 = dma.vmem_to_hbm [thread:$0]  %s4286_s26, 2048, %s7265_s10, [#allocation23], %s5973_s18, %s5973_s18, %s5974_s23  }
 0x3ff   :  { %s5934_s25 = scalar_lea.vmem %s7217_s3, 2048  ;;  %p5939_p5 = scmp.lt.s32.totalorder %s7217_s3, %s7217_s3 }
 0x400   :  { %p5935_p4 = scmp.ne.s32.totalorder %s7217_s3, %s5934_s25  ;;  %p5940_p6 = scmp.lt.s32.totalorder %s5934_s25, %s5934_s25 }
 0x402   :  { %p5941_p7 = por %p5940_p6, %p5939_p5 }
 0x404   :  { %p5942_p8 = pnand %p5941_p7, %p5935_p4 }
 0x406   :  { %5945 = shalt.err (!%p5942_p8)
}
 0x407   :  { %s5946_s28 = scalar_lea.hbm %s7266_s11, 2048 }
 0x408   :  { %p5947_p9 = scmp.ne.s32.totalorder %s7266_s11, %s5946_s28  ;;  %p5950_p10 = scmp.lt.u32.totalorder %s5946_s28, %s7266_s11 }
 0x40a   :  { %p5952_p11 = pnand %p5950_p10, %p5947_p9 }
 0x40c   :  { %5955 = shalt.err (!%p5952_p11)
}
 0x40d   :  { %4303 = dma.vmem_to_hbm [thread:$0]  %s7217_s3, 2048, %s7266_s11, [#allocation23], %s5973_s18, %s5973_s18, %s5974_s23  }
 0x40e   :  { %5966 = dma.done.wait [#allocation8], 2048  }
 0x40f   :  { %5967 = vsyncadd [#allocation8], 4294965248 }
 0x410   :  { %5968 = dma.done.wait [#allocation23], 4096  }
 0x411   :  { %5969 = vsyncadd [#allocation23], 4294963200 }
 0x412   :  { %4313 = vsyncpa [#allocation7], 1 }
 0x413   :  { %4314 = vsyncpa [#allocation10], 1 }
 0x414   :  { %4315 = vsyncpa [#allocation13], 1 }
 0x415   :  { %4316 = vsyncpa [#allocation16], 1 }
 0x416   :  { %4317 = vsyncpa [#allocation19], 1 }
 0x417   :  { %4318 = vsyncpa [#allocation8], 1 }
 0x418   :  { %4319 = vsyncpa [#allocation23], 1 }

</bundles_post_ra>
